<compile_context>
chip_gen: v7x
topology: tpu7x:2x2x1
jax: 0.10.0
libtpu: 0.0.40
codegen_flags: <defaults>
</compile_context>

<pallas_src>
import functools

import jax
import jax.numpy as jnp
from jax.experimental import pallas as pl
from jax.experimental.pallas import tpu as pltpu

_MIN_NORM = 1e-15       # geoopt clamp_min on norms
_BALL_EPS_F32 = 4e-3    # geoopt float32 ball-projection epsilon


def _hyperbolic_linear_kernel(x_ref, wt_ref, b_ref, o_ref, *, c: float, mm_dtype):
    f32 = jnp.float32
    sqrt_c = f32(c) ** 0.5
    min_norm = f32(_MIN_NORM)
    maxnorm = (f32(1.0) - f32(_BALL_EPS_F32)) / sqrt_c
    one = f32(1.0)

    x = x_ref[...].astype(f32)      # (tb, din_pad)
    b = b_ref[...].astype(f32)      # (1, dout_pad)

    def artanh(z):
        # Clamp only binds for |z| >= 1 - 1e-7; after ball projection
        # |z| <= 1 - 4e-3, so it never fires on valid inputs.
        z = jnp.clip(z, f32(-1.0 + 1e-7), f32(1.0 - 1e-7))
        return f32(0.5) * (jnp.log1p(z) - jnp.log1p(-z))

    # ---- expmap0 + project of the input: one cross-lane reduction, then pure
    # (tb, 1) column math, then a single broadcast-multiply on the x tile.
    x_norm = jnp.maximum(jnp.sqrt(jnp.sum(x * x, axis=-1, keepdims=True)), min_norm)
    coef1 = jnp.tanh(sqrt_c * x_norm) / (sqrt_c * x_norm)          # >= 0
    g1_norm = jnp.maximum(coef1 * x_norm, min_norm)                # = tanh(sc*||x||)/sc
    proj1 = jnp.minimum(one, maxnorm / g1_norm)                    # 1.0 when inside ball
    u_norm = jnp.minimum(g1_norm, maxnorm)                         # analytic ||u||
    s_in = coef1 * proj1                                           # (tb, 1)
    u = x * s_in                                                   # wide VPU pass #1

    # ---- mobius_matvec core: MXU matmul (optionally bf16 operands).
    wt = wt_ref[...]
    if mm_dtype is None:
        mu = jnp.dot(u, wt.astype(f32), preferred_element_type=f32)
    else:
        mu = jnp.dot(u.astype(mm_dtype), wt, preferred_element_type=f32)
    # mu: (tb, dout_pad)

    # ---- mobius tail + project + expmap0 + project, all (tb, 1) scalar math.
    mu_sq = jnp.sum(mu * mu, axis=-1, keepdims=True)               # cross-lane reduction #2
    mu_norm = jnp.maximum(jnp.sqrt(mu_sq), min_norm)
    ratio = jnp.tanh(mu_norm / u_norm * artanh(sqrt_c * u_norm)) / (sqrt_c * mu_norm)
    # Rows where mu == 0 map exactly to 0 (sum-of-squares == 0 <=> all zero, up
    # to f32 square underflow below ~1e-19 per element).
    ratio = jnp.where(mu_sq == f32(0.0), f32(0.0), ratio)          # >= 0
    res_norm = jnp.maximum(mu_norm * ratio, min_norm)              # analytic ||mu*ratio||
    projm = jnp.minimum(one, maxnorm / res_norm)                   # geoopt mobius project
    resp_norm = jnp.minimum(res_norm, maxnorm)
    coef2 = jnp.tanh(sqrt_c * resp_norm) / (sqrt_c * resp_norm)
    g2_norm = jnp.maximum(coef2 * resp_norm, min_norm)
    proj2 = jnp.minimum(one, maxnorm / g2_norm)
    s_out = ratio * projm * coef2 * proj2                          # (tb, 1)

    o_ref[...] = (mu * s_out + b).astype(o_ref.dtype)              # wide VPU pass #2


def hyperbolic_linear(x, weight, bias, c: float = 1.0, *, block_b: int = 512,
                      matmul_dtype=None, vmem_budget_mb: int = 40):
    """x: (B, Din), weight: (Dout, Din), bias: (Dout,) -> (B, Dout).

    Geometry is done in f32; `matmul_dtype=jnp.bfloat16` switches only the MXU
    operands to bf16 (re-validate tolerance before enabling).
    """
    B, Din = x.shape
    Dout, Din_w = weight.shape
    assert Din == Din_w and bias.shape == (Dout,)
    out_dtype = x.dtype

    # Lane-dense padding of both feature dims (multiples of 128).  Zero pad
    # rows/columns leave all norms and dot products unchanged.
    din_pad = pl.cdiv(Din, 128) * 128
    dout_pad = pl.cdiv(Dout, 128) * 128

    w_dtype = jnp.float32 if matmul_dtype is None else matmul_dtype
    w_t = jnp.zeros((din_pad, dout_pad), w_dtype).at[:Din, :Dout].set(
        weight.T.astype(w_dtype))
    b2d = jnp.zeros((1, dout_pad), jnp.float32).at[0, :Dout].set(
        bias.astype(jnp.float32))

    # ---- batch tile under an explicit VMEM budget ---------------------------
    w_bytes = din_pad * dout_pad * jnp.dtype(w_dtype).itemsize      # single-buffered
    bias_bytes = 2 * dout_pad * 4
    out_itemsize = jnp.dtype(out_dtype).itemsize
    budget = int(vmem_budget_mb) << 20

    def vmem_needed(tb):
        return (2 * tb * din_pad * 4                # x tile, double-buffered
                + 2 * tb * dout_pad * out_itemsize  # out tile, double-buffered
                + w_bytes + bias_bytes)

    align = 128 if B >= 128 else 8                  # MXU-aligned M for large B
    tb = max(align, pl.cdiv(min(block_b, B), align) * align)
    while tb > align and vmem_needed(tb) > budget:
        tb -= align

    b_pad = pl.cdiv(B, tb) * tb
    x_p = jnp.zeros((b_pad, din_pad), jnp.float32).at[:B, :Din].set(
        x.astype(jnp.float32))

    kernel = functools.partial(_hyperbolic_linear_kernel, c=float(c),
                               mm_dtype=matmul_dtype)
    vmem_limit = int(min(max(vmem_needed(tb) + (4 << 20), 32 << 20), 56 << 20))

    def build_call(single_buffer_resident: bool):
        resident_mode = pl.Buffered(1) if single_buffer_resident else None
        return pl.pallas_call(
            kernel,
            out_shape=jax.ShapeDtypeStruct((b_pad, dout_pad), out_dtype),
            grid=(b_pad // tb,),
            in_specs=[
                pl.BlockSpec((tb, din_pad), lambda i: (i, 0)),        # x tile (pipelined)
                pl.BlockSpec((din_pad, dout_pad), lambda i: (0, 0),
                             pipeline_mode=resident_mode),            # W^T resident
                pl.BlockSpec((1, dout_pad), lambda i: (0, 0),
                             pipeline_mode=resident_mode),            # bias resident
            ],
            out_specs=pl.BlockSpec((tb, dout_pad), lambda i: (i, 0)),
            compiler_params=pltpu.CompilerParams(
                dimension_semantics=("parallel",),
                vmem_limit_bytes=vmem_limit),
        )

    try:
        out = build_call(True)(x_p, w_t, b2d)
        out = jax.block_until_ready(out)
    except Exception:
        # Fallback if single-buffered resident operands are rejected by this
        # backend version; only costs one extra weight copy in VMEM.
        out = build_call(False)(x_p, w_t, b2d)
    return out[:B, :Dout]


def _reference(x, weight, bias, c=1.0):
    """Pure-jnp mirror of the geoopt PoincareBall forward (for the self-check)."""
    sqrt_c = jnp.float32(c) ** 0.5
    maxnorm = (1.0 - _BALL_EPS_F32) / sqrt_c

    def norm(v):
        return jnp.maximum(jnp.linalg.norm(v, axis=-1, keepdims=True), _MIN_NORM)

    def project(v):
        n = norm(v)
        return jnp.where(n > maxnorm, v / n * maxnorm, v)

    def expmap0(u):
        n = norm(u)
        return project(jnp.tanh(sqrt_c * n) * u / (sqrt_c * n))

    def artanh(z):
        z = jnp.clip(z, -1.0 + 1e-7, 1.0 - 1e-7)
        return 0.5 * (jnp.log1p(z) - jnp.log1p(-z))

    u = expmap0(x)
    mx = u @ weight.T
    u_n, mx_n = norm(u), norm(mx)
    res = jnp.tanh(mx_n / u_n * artanh(sqrt_c * u_n)) * mx / (mx_n * sqrt_c)
    res = jnp.where(jnp.all(mx == 0.0, axis=-1, keepdims=True), 0.0, res)
    res = project(res)   # geoopt mobius_matvec(project=True)
    return expmap0(res) + bias


if __name__ == "__main__":
    # Shapes consistent with `x = torch.randn(32, input_dim)`.
    batch, in_features, out_features, c = 32, 32, 16, 1.0

    key = jax.random.PRNGKey(0)
    kx, kw = jax.random.split(key)
    x = jax.random.normal(kx, (batch, in_features), dtype=jnp.float32)
    weight = jax.random.normal(kw, (out_features, in_features), dtype=jnp.float32)
    bias = jnp.zeros((out_features,), dtype=jnp.float32)

    out = hyperbolic_linear(x, weight, bias, c=c)
    out = jax.block_until_ready(out)

    assert out.shape == (batch, out_features)
    assert bool(jnp.all(jnp.isfinite(out)))

    ref = _reference(x, weight, bias, c=c)
    max_diff = float(jnp.max(jnp.abs(out - ref)))
    assert max_diff < 1e-3, f"kernel/reference mismatch: {max_diff}"

    print("KERNEL_OK")
</pallas_src>

<mosaic_0001>
module attributes {stable_mosaic.version = 11 : i64} {
  func.func @_hyperbolic_linear_kernel(%arg0: i32, %arg1: memref<32x128xf32, #tpu.memory_space<vmem>>, %arg2: memref<128x128xf32, #tpu.memory_space<vmem>>, %arg3: memref<1x128xf32, #tpu.memory_space<vmem>>, %arg4: memref<32x128xf32, #tpu.memory_space<vmem>>) attributes {dimension_semantics = [#tpu.dimension_semantics<parallel>], iteration_bounds = array<i64: 1>, scalar_prefetch = 0 : i64, scratch_operands = 0 : i64, tpu.core_type = #tpu.core_type<tc>, window_params = [{transform_indices = @transform_0, window_bounds = array<i64: 32, 128>}, {pipeline_mode = #tpu.pipeline_mode<synchronous>, transform_indices = @transform_1, window_bounds = array<i64: 128, 128>}, {pipeline_mode = #tpu.pipeline_mode<synchronous>, transform_indices = @transform_2, window_bounds = array<i64: 1, 128>}, {transform_indices = @transform_3, window_bounds = array<i64: 32, 128>}]} {
    %cst = arith.constant 1.000000e+00 : f32
    %cst_0 = arith.constant 5.000000e-01 : f32
    %0 = math.powf %cst, %cst_0 : f32
    %cst_1 = arith.constant 1.000000e+00 : f32
    %cst_2 = arith.constant 4.000000e-03 : f32
    %1 = arith.subf %cst_1, %cst_2 : f32
    %2 = arith.divf %1, %0 : f32
    %c0 = arith.constant 0 : index
    %c0_3 = arith.constant 0 : index
    %3 = vector.load %arg1[%c0, %c0_3] : memref<32x128xf32, #tpu.memory_space<vmem>>, vector<32x128xf32>
    %c0_4 = arith.constant 0 : index
    %c0_5 = arith.constant 0 : index
    %4 = vector.load %arg3[%c0_4, %c0_5] : memref<1x128xf32, #tpu.memory_space<vmem>>, vector<1x128xf32>
    %5 = arith.mulf %3, %3 : vector<32x128xf32>
    %cst_6 = arith.constant dense<0.000000e+00> : vector<32xf32>
    %6 = vector.multi_reduction <add>, %5, %cst_6 [1] : vector<32x128xf32> to vector<32xf32>
    %7 = vector.shape_cast %6 : vector<32xf32> to vector<32x1xf32>
    %8 = math.sqrt %7 : vector<32x1xf32>
    %cst_7 = arith.constant 1.000000e-15 : f32
    %9 = vector.broadcast %cst_7 : f32 to vector<32x1xf32>
    %10 = arith.maximumf %8, %9 : vector<32x1xf32>
    %11 = vector.broadcast %0 : f32 to vector<32x1xf32>
    %12 = arith.mulf %11, %10 : vector<32x1xf32>
    %13 = math.tanh %12 : vector<32x1xf32>
    %14 = vector.broadcast %0 : f32 to vector<32x1xf32>
    %15 = arith.mulf %14, %10 : vector<32x1xf32>
    %16 = arith.divf %13, %15 : vector<32x1xf32>
    %17 = arith.mulf %16, %10 : vector<32x1xf32>
    %cst_8 = arith.constant 1.000000e-15 : f32
    %18 = vector.broadcast %cst_8 : f32 to vector<32x1xf32>
    %19 = arith.maximumf %17, %18 : vector<32x1xf32>
    %20 = vector.broadcast %2 : f32 to vector<32x1xf32>
    %21 = arith.divf %20, %19 : vector<32x1xf32>
    %cst_9 = arith.constant 1.000000e+00 : f32
    %22 = vector.broadcast %cst_9 : f32 to vector<32x1xf32>
    %23 = arith.minimumf %22, %21 : vector<32x1xf32>
    %24 = vector.broadcast %2 : f32 to vector<32x1xf32>
    %25 = arith.minimumf %19, %24 : vector<32x1xf32>
    %26 = arith.mulf %16, %23 : vector<32x1xf32>
    %27 = vector.broadcast %26 : vector<32x1xf32> to vector<32x128xf32>
    %28 = arith.mulf %3, %27 : vector<32x128xf32>
    %c0_10 = arith.constant 0 : index
    %c0_11 = arith.constant 0 : index
    %29 = vector.load %arg2[%c0_10, %c0_11] : memref<128x128xf32, #tpu.memory_space<vmem>>, vector<128x128xf32>
    %cst_12 = arith.constant dense<0.000000e+00> : vector<32x128xf32>
    %30 = tpu.matmul %28, %29, %cst_12 {dimension_numbers = #tpu.dot_dimension_numbers<[1], [0], [0], [1], [0, 0, 1, 1], [], []>} : vector<32x128xf32>, vector<128x128xf32>, vector<32x128xf32> -> vector<32x128xf32>
    %31 = arith.mulf %30, %30 : vector<32x128xf32>
    %cst_13 = arith.constant dense<0.000000e+00> : vector<32xf32>
    %32 = vector.multi_reduction <add>, %31, %cst_13 [1] : vector<32x128xf32> to vector<32xf32>
    %33 = vector.shape_cast %32 : vector<32xf32> to vector<32x1xf32>
    %34 = math.sqrt %33 : vector<32x1xf32>
    %cst_14 = arith.constant 1.000000e-15 : f32
    %35 = vector.broadcast %cst_14 : f32 to vector<32x1xf32>
    %36 = arith.maximumf %34, %35 : vector<32x1xf32>
    %37 = arith.divf %36, %25 : vector<32x1xf32>
    %38 = vector.broadcast %0 : f32 to vector<32x1xf32>
    %39 = arith.mulf %38, %25 : vector<32x1xf32>
    %cst_15 = arith.constant -0.99999988 : f32
    %cst_16 = arith.constant 0.99999988 : f32
    %40 = vector.broadcast %cst_15 : f32 to vector<32x1xf32>
    %41 = arith.maximumf %40, %39 : vector<32x1xf32>
    %42 = vector.broadcast %cst_16 : f32 to vector<32x1xf32>
    %43 = arith.minimumf %42, %41 : vector<32x1xf32>
    %44 = math.log1p %43 : vector<32x1xf32>
    %cst_17 = arith.constant 0.000000e+00 : f32
    %45 = vector.broadcast %cst_17 : f32 to vector<32x1xf32>
    %46 = arith.subf %45, %43 : vector<32x1xf32>
    %47 = math.log1p %46 : vector<32x1xf32>
    %48 = arith.subf %44, %47 : vector<32x1xf32>
    %cst_18 = arith.constant 5.000000e-01 : f32
    %49 = vector.broadcast %cst_18 : f32 to vector<32x1xf32>
    %50 = arith.mulf %49, %48 : vector<32x1xf32>
    %51 = arith.mulf %37, %50 : vector<32x1xf32>
    %52 = math.tanh %51 : vector<32x1xf32>
    %53 = vector.broadcast %0 : f32 to vector<32x1xf32>
    %54 = arith.mulf %53, %36 : vector<32x1xf32>
    %55 = arith.divf %52, %54 : vector<32x1xf32>
    %cst_19 = arith.constant 0.000000e+00 : f32
    %56 = vector.broadcast %cst_19 : f32 to vector<32x1xf32>
    %57 = arith.cmpf oeq, %33, %56 : vector<32x1xf32>
    %cst_20 = arith.constant 0.000000e+00 : f32
    %58 = vector.broadcast %cst_20 : f32 to vector<32x1xf32>
    %59 = arith.select %57, %58, %55 : vector<32x1xi1>, vector<32x1xf32>
    %60 = arith.mulf %36, %59 : vector<32x1xf32>
    %cst_21 = arith.constant 1.000000e-15 : f32
    %61 = vector.broadcast %cst_21 : f32 to vector<32x1xf32>
    %62 = arith.maximumf %60, %61 : vector<32x1xf32>
    %63 = vector.broadcast %2 : f32 to vector<32x1xf32>
    %64 = arith.divf %63, %62 : vector<32x1xf32>
    %cst_22 = arith.constant 1.000000e+00 : f32
    %65 = vector.broadcast %cst_22 : f32 to vector<32x1xf32>
    %66 = arith.minimumf %65, %64 : vector<32x1xf32>
    %67 = vector.broadcast %2 : f32 to vector<32x1xf32>
    %68 = arith.minimumf %62, %67 : vector<32x1xf32>
    %69 = vector.broadcast %0 : f32 to vector<32x1xf32>
    %70 = arith.mulf %69, %68 : vector<32x1xf32>
    %71 = math.tanh %70 : vector<32x1xf32>
    %72 = vector.broadcast %0 : f32 to vector<32x1xf32>
    %73 = arith.mulf %72, %68 : vector<32x1xf32>
    %74 = arith.divf %71, %73 : vector<32x1xf32>
    %75 = arith.mulf %74, %68 : vector<32x1xf32>
    %cst_23 = arith.constant 1.000000e-15 : f32
    %76 = vector.broadcast %cst_23 : f32 to vector<32x1xf32>
    %77 = arith.maximumf %75, %76 : vector<32x1xf32>
    %78 = vector.broadcast %2 : f32 to vector<32x1xf32>
    %79 = arith.divf %78, %77 : vector<32x1xf32>
    %cst_24 = arith.constant 1.000000e+00 : f32
    %80 = vector.broadcast %cst_24 : f32 to vector<32x1xf32>
    %81 = arith.minimumf %80, %79 : vector<32x1xf32>
    %82 = arith.mulf %59, %66 : vector<32x1xf32>
    %83 = arith.mulf %82, %74 : vector<32x1xf32>
    %84 = arith.mulf %83, %81 : vector<32x1xf32>
    %85 = vector.broadcast %84 : vector<32x1xf32> to vector<32x128xf32>
    %86 = arith.mulf %30, %85 : vector<32x128xf32>
    %87 = vector.broadcast %4 : vector<1x128xf32> to vector<32x128xf32>
    %88 = arith.addf %86, %87 : vector<32x128xf32>
    %c0_25 = arith.constant 0 : index
    %c0_26 = arith.constant 0 : index
    %89 = vector.load %arg4[%c0_25, %c0_26] : memref<32x128xf32, #tpu.memory_space<vmem>>, vector<32x128xf32>
    tpu.vector_store %arg4[%c0_25, %c0_26], %88 {strides = array<i32>} : memref<32x128xf32, #tpu.memory_space<vmem>>, vector<32x128xf32>,
    return
  }
  func.func @transform_0(%arg0: i32) -> (i32, i32) {
    %c0_i32 = arith.constant 0 : i32
    %c0_i32_0 = arith.constant 0 : i32
    return %arg0, %c0_i32 : i32, i32
  }
  func.func @transform_1(%arg0: i32) -> (i32, i32) {
    %c0_i32 = arith.constant 0 : i32
    %c0_i32_0 = arith.constant 0 : i32
    %c0_i32_1 = arith.constant 0 : i32
    return %c0_i32, %c0_i32_0 : i32, i32
  }
  func.func @transform_2(%arg0: i32) -> (i32, i32) {
    %c0_i32 = arith.constant 0 : i32
    %c0_i32_0 = arith.constant 0 : i32
    %c0_i32_1 = arith.constant 0 : i32
    return %c0_i32, %c0_i32_0 : i32, i32
  }
  func.func @transform_3(%arg0: i32) -> (i32, i32) {
    %c0_i32 = arith.constant 0 : i32
    %c0_i32_0 = arith.constant 0 : i32
    return %arg0, %c0_i32 : i32, i32
  }
}

module attributes {stable_mosaic.version = 11 : i64} {
  func.func @_hyperbolic_linear_kernel(%arg0: i32, %arg1: memref<32x128xf32, #tpu.memory_space<vmem>>, %arg2: memref<128x128xf32, #tpu.memory_space<vmem>>, %arg3: memref<1x128xf32, #tpu.memory_space<vmem>>, %arg4: memref<32x128xf32, #tpu.memory_space<vmem>>) attributes {dimension_semantics = [#tpu.dimension_semantics<parallel>], iteration_bounds = array<i64: 1>, scalar_prefetch = 0 : i64, scratch_operands = 0 : i64, tpu.core_type = #tpu.core_type<tc>, window_params = [{transform_indices = @transform_0, window_bounds = array<i64: 32, 128>}, {pipeline_mode = #tpu.pipeline_mode<synchronous>, transform_indices = @transform_1, window_bounds = array<i64: 128, 128>}, {pipeline_mode = #tpu.pipeline_mode<synchronous>, transform_indices = @transform_2, window_bounds = array<i64: 1, 128>}, {transform_indices = @transform_3, window_bounds = array<i64: 32, 128>}]} {
    %cst = arith.constant 1.000000e+00 : f32
    %cst_0 = arith.constant 5.000000e-01 : f32
    %0 = math.powf %cst, %cst_0 : f32
    %cst_1 = arith.constant 1.000000e+00 : f32
    %cst_2 = arith.constant 4.000000e-03 : f32
    %1 = arith.subf %cst_1, %cst_2 : f32
    %2 = arith.divf %1, %0 : f32
    %c0 = arith.constant 0 : index
    %c0_3 = arith.constant 0 : index
    %3 = vector.load %arg1[%c0, %c0_3] : memref<32x128xf32, #tpu.memory_space<vmem>>, vector<32x128xf32>
    %c0_4 = arith.constant 0 : index
    %c0_5 = arith.constant 0 : index
    %4 = vector.load %arg3[%c0_4, %c0_5] : memref<1x128xf32, #tpu.memory_space<vmem>>, vector<1x128xf32>
    %5 = arith.mulf %3, %3 : vector<32x128xf32>
    %cst_6 = arith.constant dense<0.000000e+00> : vector<32xf32>
    %6 = vector.multi_reduction <add>, %5, %cst_6 [1] : vector<32x128xf32> to vector<32xf32>
    %7 = vector.shape_cast %6 : vector<32xf32> to vector<32x1xf32>
    %8 = math.sqrt %7 : vector<32x1xf32>
    %cst_7 = arith.constant 1.000000e-15 : f32
    %9 = vector.broadcast %cst_7 : f32 to vector<32x1xf32>
    %10 = arith.maximumf %8, %9 : vector<32x1xf32>
    %11 = vector.broadcast %0 : f32 to vector<32x1xf32>
    %12 = arith.mulf %11, %10 : vector<32x1xf32>
    %13 = math.tanh %12 : vector<32x1xf32>
    %14 = vector.broadcast %0 : f32 to vector<32x1xf32>
    %15 = arith.mulf %14, %10 : vector<32x1xf32>
    %16 = arith.divf %13, %15 : vector<32x1xf32>
    %17 = arith.mulf %16, %10 : vector<32x1xf32>
    %cst_8 = arith.constant 1.000000e-15 : f32
    %18 = vector.broadcast %cst_8 : f32 to vector<32x1xf32>
    %19 = arith.maximumf %17, %18 : vector<32x1xf32>
    %20 = vector.broadcast %2 : f32 to vector<32x1xf32>
    %21 = arith.divf %20, %19 : vector<32x1xf32>
    %cst_9 = arith.constant 1.000000e+00 : f32
    %22 = vector.broadcast %cst_9 : f32 to vector<32x1xf32>
    %23 = arith.minimumf %22, %21 : vector<32x1xf32>
    %24 = vector.broadcast %2 : f32 to vector<32x1xf32>
    %25 = arith.minimumf %19, %24 : vector<32x1xf32>
    %26 = arith.mulf %16, %23 : vector<32x1xf32>
    %27 = vector.broadcast %26 : vector<32x1xf32> to vector<32x128xf32>
    %28 = arith.mulf %3, %27 : vector<32x128xf32>
    %c0_10 = arith.constant 0 : index
    %c0_11 = arith.constant 0 : index
    %29 = vector.load %arg2[%c0_10, %c0_11] : memref<128x128xf32, #tpu.memory_space<vmem>>, vector<128x128xf32>
    %cst_12 = arith.constant dense<0.000000e+00> : vector<32x128xf32>
    %30 = tpu.matmul %28, %29, %cst_12 {dimension_numbers = #tpu.dot_dimension_numbers<[1], [0], [0], [1], [0, 0, 1, 1], [], []>} : vector<32x128xf32>, vector<128x128xf32>, vector<32x128xf32> -> vector<32x128xf32>
    %31 = arith.mulf %30, %30 : vector<32x128xf32>
    %cst_13 = arith.constant dense<0.000000e+00> : vector<32xf32>
    %32 = vector.multi_reduction <add>, %31, %cst_13 [1] : vector<32x128xf32> to vector<32xf32>
    %33 = vector.shape_cast %32 : vector<32xf32> to vector<32x1xf32>
    %34 = math.sqrt %33 : vector<32x1xf32>
    %cst_14 = arith.constant 1.000000e-15 : f32
    %35 = vector.broadcast %cst_14 : f32 to vector<32x1xf32>
    %36 = arith.maximumf %34, %35 : vector<32x1xf32>
    %37 = arith.divf %36, %25 : vector<32x1xf32>
    %38 = vector.broadcast %0 : f32 to vector<32x1xf32>
    %39 = arith.mulf %38, %25 : vector<32x1xf32>
    %cst_15 = arith.constant -0.99999988 : f32
    %cst_16 = arith.constant 0.99999988 : f32
    %40 = vector.broadcast %cst_15 : f32 to vector<32x1xf32>
    %41 = arith.maximumf %40, %39 : vector<32x1xf32>
    %42 = vector.broadcast %cst_16 : f32 to vector<32x1xf32>
    %43 = arith.minimumf %42, %41 : vector<32x1xf32>
    %44 = math.log1p %43 : vector<32x1xf32>
    %cst_17 = arith.constant 0.000000e+00 : f32
    %45 = vector.broadcast %cst_17 : f32 to vector<32x1xf32>
    %46 = arith.subf %45, %43 : vector<32x1xf32>
    %47 = math.log1p %46 : vector<32x1xf32>
    %48 = arith.subf %44, %47 : vector<32x1xf32>
    %cst_18 = arith.constant 5.000000e-01 : f32
    %49 = vector.broadcast %cst_18 : f32 to vector<32x1xf32>
    %50 = arith.mulf %49, %48 : vector<32x1xf32>
    %51 = arith.mulf %37, %50 : vector<32x1xf32>
    %52 = math.tanh %51 : vector<32x1xf32>
    %53 = vector.broadcast %0 : f32 to vector<32x1xf32>
    %54 = arith.mulf %53, %36 : vector<32x1xf32>
    %55 = arith.divf %52, %54 : vector<32x1xf32>
    %cst_19 = arith.constant 0.000000e+00 : f32
    %56 = vector.broadcast %cst_19 : f32 to vector<32x1xf32>
    %57 = arith.cmpf oeq, %33, %56 : vector<32x1xf32>
    %cst_20 = arith.constant 0.000000e+00 : f32
    %58 = vector.broadcast %cst_20 : f32 to vector<32x1xf32>
    %59 = arith.select %57, %58, %55 : vector<32x1xi1>, vector<32x1xf32>
    %60 = arith.mulf %36, %59 : vector<32x1xf32>
    %cst_21 = arith.constant 1.000000e-15 : f32
    %61 = vector.broadcast %cst_21 : f32 to vector<32x1xf32>
    %62 = arith.maximumf %60, %61 : vector<32x1xf32>
    %63 = vector.broadcast %2 : f32 to vector<32x1xf32>
    %64 = arith.divf %63, %62 : vector<32x1xf32>
    %cst_22 = arith.constant 1.000000e+00 : f32
    %65 = vector.broadcast %cst_22 : f32 to vector<32x1xf32>
    %66 = arith.minimumf %65, %64 : vector<32x1xf32>
    %67 = vector.broadcast %2 : f32 to vector<32x1xf32>
    %68 = arith.minimumf %62, %67 : vector<32x1xf32>
    %69 = vector.broadcast %0 : f32 to vector<32x1xf32>
    %70 = arith.mulf %69, %68 : vector<32x1xf32>
    %71 = math.tanh %70 : vector<32x1xf32>
    %72 = vector.broadcast %0 : f32 to vector<32x1xf32>
    %73 = arith.mulf %72, %68 : vector<32x1xf32>
    %74 = arith.divf %71, %73 : vector<32x1xf32>
    %75 = arith.mulf %74, %68 : vector<32x1xf32>
    %cst_23 = arith.constant 1.000000e-15 : f32
    %76 = vector.broadcast %cst_23 : f32 to vector<32x1xf32>
    %77 = arith.maximumf %75, %76 : vector<32x1xf32>
    %78 = vector.broadcast %2 : f32 to vector<32x1xf32>
    %79 = arith.divf %78, %77 : vector<32x1xf32>
    %cst_24 = arith.constant 1.000000e+00 : f32
    %80 = vector.broadcast %cst_24 : f32 to vector<32x1xf32>
    %81 = arith.minimumf %80, %79 : vector<32x1xf32>
    %82 = arith.mulf %59, %66 : vector<32x1xf32>
    %83 = arith.mulf %82, %74 : vector<32x1xf32>
    %84 = arith.mulf %83, %81 : vector<32x1xf32>
    %85 = vector.broadcast %84 : vector<32x1xf32> to vector<32x128xf32>
    %86 = arith.mulf %30, %85 : vector<32x128xf32>
    %87 = vector.broadcast %4 : vector<1x128xf32> to vector<32x128xf32>
    %88 = arith.addf %86, %87 : vector<32x128xf32>
    %c0_25 = arith.constant 0 : index
    %c0_26 = arith.constant 0 : index
    %89 = vector.load %arg4[%c0_25, %c0_26] : memref<32x128xf32, #tpu.memory_space<vmem>>, vector<32x128xf32>
    tpu.vector_store %arg4[%c0_25, %c0_26], %88 {strides = array<i32>} : memref<32x128xf32, #tpu.memory_space<vmem>>, vector<32x128xf32>,
    return
  }
  func.func @transform_0(%arg0: i32) -> (i32, i32) {
    %c0_i32 = arith.constant 0 : i32
    %c0_i32_0 = arith.constant 0 : i32
    return %arg0, %c0_i32 : i32, i32
  }
  func.func @transform_1(%arg0: i32) -> (i32, i32) {
    %c0_i32 = arith.constant 0 : i32
    %c0_i32_0 = arith.constant 0 : i32
    %c0_i32_1 = arith.constant 0 : i32
    return %c0_i32, %c0_i32_0 : i32, i32
  }
  func.func @transform_2(%arg0: i32) -> (i32, i32) {
    %c0_i32 = arith.constant 0 : i32
    %c0_i32_0 = arith.constant 0 : i32
    %c0_i32_1 = arith.constant 0 : i32
    return %c0_i32, %c0_i32_0 : i32, i32
  }
  func.func @transform_3(%arg0: i32) -> (i32, i32) {
    %c0_i32 = arith.constant 0 : i32
    %c0_i32_0 = arith.constant 0 : i32
    return %arg0, %c0_i32 : i32, i32
  }
}

</mosaic_0001>

<bundles_post_ra>
// kernel: tpu_custom_call.1
= control target key start
LH: loop header
LB: loop body
LE: loop exit
PB: predicated region body
PF: predicated region fallthrough
CT: control target
= control target key end

     0   :  { %8 = vsyncpa [#allocation3], 0  ;;  %s1071_s0 = inlined_call_operand.hbm [shape: f32[32,128], index: 0, kind: input, shape index: {}]   ;;  %s1072_s1 = inlined_call_operand.hbm [shape: f32[128,128], index: 1, kind: input, shape index: {}]   ;;  %s1073_s2 = inlined_call_operand.vmem [shape: f32[1,128], index: 2, kind: input, shape index: {}]   ;;  %s1074_s3 = inlined_call_operand.hbm [shape: f32[32,128], index: 3, kind: output, shape index: {}]  }
   0x1   :  { %9 = vsyncpa [#allocation6], 0 }
   0x2   :  { %10 = vsyncpa [#allocation4], 0  ;;  %s809_s12 = smov [#allocation2]   ;;  %s737_s16 = scalar_lea.hbm %s1071_s0, 512 }
   0x3   :  { %s16_s13 = sshll.u32 %s809_s12, 4  ;;  %p738_p0 = scmp.ne.s32.totalorder %s1071_s0, %s737_s16  ;;  %s17_s13 = int_to_ptr.vmem [resolvable:$true] %s16_s13 }
   0x4   :  { %p741_p1 = scmp.lt.u32.totalorder %s737_s16, %s1071_s0 }
   0x6   :  { %p743_p2 = pnand %p741_p1, %p738_p0 }
   0x8   :  { %746 = shalt.err (!%p743_p2)
}
   0x9   :  { %s747_s21 = scalar_lea.vmem %s17_s13, 512  ;;  %p752_p4 = scmp.lt.s32.totalorder %s17_s13, %s17_s13 }
   0xa   :  { %p748_p3 = scmp.ne.s32.totalorder %s17_s13, %s747_s21  ;;  %p753_p5 = scmp.lt.s32.totalorder %s747_s21, %s747_s21 }
   0xc   :  { %p754_p6 = por %p753_p5, %p752_p4 }
   0xe   :  { %p755_p7 = pnand %p754_p6, %p748_p3 }
  0x10   :  { %758 = shalt.err (!%p755_p7)
}
  0x11   :  { %s810_s22 = smov 128   ;;  %s811_s23 = smov 8  }
  0x12   :  { %22 = dma.hbm_to_vmem [thread:$0]  %s1071_s0, 512, %s17_s13, [#allocation3], %s810_s22, %s810_s22, %s811_s23  }
  0x13   :  { %s812_s26 = smov [#allocation5]   ;;  %s759_s30 = scalar_lea.hbm %s1072_s1, 2048 }
  0x14   :  { %s28_s27 = sshll.u32 %s812_s26, 4  ;;  %p760_p8 = scmp.ne.s32.totalorder %s1072_s1, %s759_s30  ;;  %s29_s27 = int_to_ptr.vmem [resolvable:$true] %s28_s27 }
  0x15   :  { %p763_p9 = scmp.lt.u32.totalorder %s759_s30, %s1072_s1 }
  0x17   :  { %p765_p10 = pnand %p763_p9, %p760_p8 }
  0x19   :  { %768 = shalt.err (!%p765_p10)
}
  0x1a   :  { %s769_s8 = scalar_lea.vmem %s29_s27, 2048  ;;  %p774_p12 = scmp.lt.s32.totalorder %s29_s27, %s29_s27 }
  0x1b   :  { %p770_p11 = scmp.ne.s32.totalorder %s29_s27, %s769_s8  ;;  %p775_p13 = scmp.lt.s32.totalorder %s769_s8, %s769_s8 }
  0x1d   :  { %p776_p0 = por %p775_p13, %p774_p12 }
  0x1f   :  { %p777_p1 = pnand %p776_p0, %p770_p11 }
  0x21   :  { %780 = shalt.err (!%p777_p1)
}
  0x22   :  { %34 = dma.hbm_to_vmem [thread:$0]  %s1072_s1, 2048, %s29_s27, [#allocation6], %s810_s22, %s810_s22, %s811_s23  }
  0x23   :  { %803 = dma.done.wait [#allocation3], 512  }
  0x24   :  { %804 = vsyncadd [#allocation3], 4294966784 }
  0x25   :  { %805 = dma.done.wait [#allocation6], 2048  }
  0x26   :  { %806 = vsyncadd [#allocation6], 4294965248  ;;  %v864_v0 = vld [vmem:[#allocation2 + $0x8] sm:$0xff]  ;;  %v866_v1 = vld [vmem:[#allocation2] sm:$0xff] }
  0x27   :  { %v868_v2 = vld [vmem:[#allocation2 + $0x18] sm:$0xff]  ;;  %v49_v3 = vmul.f32 %v864_v0, %v864_v0  ;;  %v48_v4 = vmul.f32 %v866_v1, %v866_v1  ;;  %v874_v5 = vld [vmem:[#allocation2 + $0x10] sm:$0xff]  ;;  %v136_v8 = vld [vmem:[#allocation5] sm:$0xff] }
  0x28   :  { %v51_v6 = vmul.f32 %v868_v2, %v868_v2  ;;  %v50_v7 = vmul.f32 %v874_v5, %v874_v5  ;;  %v137_v9 = vld [vmem:[#allocation5 + $0x8] sm:$0xff]  ;;  %v138_v11 = vld [vmem:[#allocation5 + $0x10] sm:$0xff]  ;;  %v139_v12 = vld [vmem:[#allocation5 + $0x18] sm:$0xff] }
  0x29   :  { %54 = vadd.xlane.f32.xlu1 %v49_v3  ;;  %52 = vadd.xlane.f32.xlu0 %v48_v4  ;;  %v572_v10 = vpack.c.bf16 %v137_v9, %v136_v8  ;;  %v140_v13 = vld [vmem:[#allocation5 + $0x20] sm:$0xff]  ;;  %v576_v14 = vpack.c.bf16 %v139_v12, %v138_v11  ;;  %v141_v15 = vld [vmem:[#allocation5 + $0x28] sm:$0xff]  ;;  %v142_v17 = vld [vmem:[#allocation5 + $0x30] sm:$0xff] }
  0x2a   :  { %v580_v16 = vpack.c.bf16 %v141_v15, %v140_v13  ;;  %v143_v18 = vld [vmem:[#allocation5 + $0x38] sm:$0xff]  ;;  %v144_v20 = vld [vmem:[#allocation5 + $0x40] sm:$0xff]  ;;  %v145_v21 = vld [vmem:[#allocation5 + $0x48] sm:$0xff] }
  0x2b   :  { %573 = vmatprep.subr.bf16.mxu0 %v572_v10  ;;  %604 = vmatprep.subr.bf16.mxu1 %v572_v10  ;;  %v584_v19 = vpack.c.bf16 %v143_v18, %v142_v17  ;;  %v588_v22 = vpack.c.bf16 %v145_v21, %v144_v20  ;;  %v146_v23 = vld [vmem:[#allocation5 + $0x50] sm:$0xff]  ;;  %v147_v24 = vld [vmem:[#allocation5 + $0x58] sm:$0xff]  ;;  %v148_v26 = vld [vmem:[#allocation5 + $0x60] sm:$0xff] }
  0x2c   :  { %575 = vmatpush3.bf16.msra.mxu0 %v572_v10  ;;  %612 = vmatpush3.bf16.msra.mxu1 %v572_v10  ;;  %v592_v25 = vpack.c.bf16 %v147_v24, %v146_v23  ;;  %v149_v27 = vld [vmem:[#allocation5 + $0x68] sm:$0xff]  ;;  %v150_v29 = vld [vmem:[#allocation5 + $0x70] sm:$0xff]  ;;  %v151_v30 = vld [vmem:[#allocation5 + $0x78] sm:$0xff] }
  0x2d   :  { %58 = vadd.xlane.f32.xlu1 %v51_v6  ;;  %56 = vadd.xlane.f32.xlu0 %v50_v7  ;;  %v596_v28 = vpack.c.bf16 %v149_v27, %v148_v26  ;;  %v600_v31 = vpack.c.bf16 %v151_v30, %v150_v29 }
  0x2e   :  { %577 = vmatprep.subr.bf16.mxu0 %v576_v14  ;;  %605 = vmatprep.subr.bf16.mxu1 %v576_v14 }
  0x30   :  { %579 = vmatpush3.bf16.msra.mxu0 %v576_v14  ;;  %613 = vmatpush3.bf16.msra.mxu1 %v576_v14 }
  0x31   :  { %581 = vmatprep.subr.bf16.mxu0 %v580_v16  ;;  %606 = vmatprep.subr.bf16.mxu1 %v580_v16 }
  0x34   :  { %583 = vmatpush3.bf16.msra.mxu0 %v580_v16  ;;  %614 = vmatpush3.bf16.msra.mxu1 %v580_v16 }
  0x35   :  { %585 = vmatprep.subr.bf16.mxu0 %v584_v19  ;;  %607 = vmatprep.subr.bf16.mxu1 %v584_v19 }
  0x38   :  { %587 = vmatpush3.bf16.msra.mxu0 %v584_v19  ;;  %615 = vmatpush3.bf16.msra.mxu1 %v584_v19 }
  0x39   :  { %589 = vmatprep.subr.bf16.mxu0 %v588_v22  ;;  %608 = vmatprep.subr.bf16.mxu1 %v588_v22 }
  0x3c   :  { %591 = vmatpush3.bf16.msra.mxu0 %v588_v22  ;;  %616 = vmatpush3.bf16.msra.mxu1 %v588_v22 }
  0x3d   :  { %593 = vmatprep.subr.bf16.mxu0 %v592_v25  ;;  %609 = vmatprep.subr.bf16.mxu1 %v592_v25 }
  0x40   :  { %595 = vmatpush3.bf16.msra.mxu0 %v592_v25  ;;  %617 = vmatpush3.bf16.msra.mxu1 %v592_v25 }
  0x41   :  { %597 = vmatprep.subr.bf16.mxu0 %v596_v28  ;;  %610 = vmatprep.subr.bf16.mxu1 %v596_v28 }
  0x44   :  { %599 = vmatpush3.bf16.msra.mxu0 %v596_v28  ;;  %618 = vmatpush3.bf16.msra.mxu1 %v596_v28 }
  0x45   :  { %601 = vmatprep.subr.bf16.mxu0 %v600_v31  ;;  %611 = vmatprep.subr.bf16.mxu1 %v600_v31 }
  0x48   :  { %603 = vmatpush3.bf16.msra.mxu0 %v600_v31  ;;  %619 = vmatpush3.bf16.msra.mxu1 %v600_v31 }
  0xb6   :  { %v55_v32 = vpop.xlane.xlu1 %54  ;;  %v53_v33 = vpop.xlane.xlu0 %52 }
  0xb7   :  { %625 = vrsqrt.f32 %v55_v32  ;;  %vm69_vm0 = vcmp.eq.f32.partialorder %v55_v32, inf  ;;  %v72_v39 = vand.u32 2147483648, %v55_v32  ;;  %vm71_vm1 = vcmp.eq.f32.partialorder %v55_v32, 0.0 }
  0xb8   :  { %627 = vrsqrt.f32 %v53_v33  ;;  %vm62_vm2 = vcmp.eq.f32.partialorder %v53_v33, inf  ;;  %v65_v42 = vand.u32 2147483648, %v53_v33  ;;  %vm64_vm3 = vcmp.eq.f32.partialorder %v53_v33, 0.0 }
  0xba   :  { %v59_v34 = vpop.xlane.xlu1 %58  ;;  %v57_v35 = vpop.xlane.xlu0 %56 }
  0xbb   :  { %629 = vrsqrt.f32 %v59_v34  ;;  %vm83_vm4 = vcmp.eq.f32.partialorder %v59_v34, inf  ;;  %vm85_vm5 = vcmp.eq.f32.partialorder %v59_v34, 0.0  ;;  %v86_v50 = vand.u32 2147483648, %v59_v34 }
  0xbc   :  { %631 = vrsqrt.f32 %v57_v35  ;;  %vm76_vm6 = vcmp.eq.f32.partialorder %v57_v35, inf  ;;  %v79_v54 = vand.u32 2147483648, %v57_v35  ;;  %vm78_vm7 = vcmp.eq.f32.partialorder %v57_v35, 0.0 }
  0xc1   :  { %v626_v36 = vpop.eup %625 }
  0xc2   :  { %v628_v37 = vpop.eup %627  ;;  %v68_v38 = vmul.f32 %v626_v36, %v55_v32 }
  0xc3   :  { %v61_v40 = vmul.f32 %v628_v37, %v53_v33 }
  0xc4   :  { %v70_v41 = vsel %vm69_vm0, %v55_v32, %v68_v38 }
  0xc5   :  { %v630_v43 = vpop.eup %629  ;;  %v73_v44 = vsel %vm71_vm1, %v72_v39, %v70_v41  ;;  %v63_v45 = vsel %vm62_vm2, %v53_v33, %v61_v40 }
  0xc6   :  { %v632_v46 = vpop.eup %631  ;;  %v89_v47 = vmax.f32 %v73_v44, 1e-15  ;;  %v82_v48 = vmul.f32 %v630_v43, %v59_v34  ;;  %v66_v49 = vsel %vm64_vm3, %v65_v42, %v63_v45 }
  0xc7   :  { %v75_v51 = vmul.f32 %v632_v46, %v57_v35  ;;  %v88_v52 = vmax.f32 %v66_v49, 1e-15 }
  0xc8   :  { %633 = vtanh.f32 %v89_v47  ;;  %v84_v53 = vsel %vm83_vm4, %v59_v34, %v82_v48 }
  0xc9   :  { %635 = vrcp.f32 %v89_v47  ;;  %v87_v55 = vsel %vm85_vm5, %v86_v50, %v84_v53  ;;  %v77_v56 = vsel %vm76_vm6, %v57_v35, %v75_v51 }
  0xca   :  { %v91_v57 = vmax.f32 %v87_v55, 1e-15  ;;  %637 = vtanh.f32 %v88_v52  ;;  %v80_v58 = vsel %vm78_vm7, %v79_v54, %v77_v56 }
  0xcb   :  { %639 = vrcp.f32 %v88_v52  ;;  %v90_v59 = vmax.f32 %v80_v58, 1e-15 }
  0xcc   :  { %641 = vtanh.f32 %v91_v57 }
  0xcd   :  { %643 = vrcp.f32 %v91_v57 }
  0xce   :  { %645 = vtanh.f32 %v90_v59 }
  0xcf   :  { %647 = vrcp.f32 %v90_v59 }
  0xd2   :  { %v634_v60 = vpop.eup %633 }
  0xd3   :  { %v636_v61 = vpop.eup %635 }
  0xd4   :  { %v638_v62 = vpop.eup %637  ;;  %v99_v63 = vmul.f32 %v636_v61, %v634_v60 }
  0xd5   :  { %v640_v3 = vpop.eup %639 }
  0xd6   :  { %v642_v4 = vpop.eup %641  ;;  %v97_v6 = vmul.f32 %v640_v3, %v638_v62  ;;  %v105_v7 = vmul.f32 %v99_v63, %v89_v47 }
  0xd7   :  { %v644_v8 = vpop.eup %643 }
  0xd8   :  { %v646_v9 = vpop.eup %645  ;;  %v104_v10 = vmul.f32 %v97_v6, %v88_v52  ;;  %v109_v11 = vmax.f32 %v105_v7, 1e-15  ;;  %v103_v12 = vmul.f32 %v644_v8, %v642_v4 }
  0xd9   :  { %v648_v13 = vpop.eup %647 }
  0xda   :  { %v108_v14 = vmax.f32 %v104_v10, 1e-15  ;;  %649 = vrcp.f32 %v109_v11  ;;  %v101_v15 = vmul.f32 %v648_v13, %v646_v9  ;;  %v107_v16 = vmul.f32 %v103_v12, %v91_v57 }
  0xdb   :  { %v125_v44 = vmin.f32 %v109_v11, 0.996 }
  0xdc   :  { %651 = vrcp.f32 %v108_v14  ;;  %v106_v17 = vmul.f32 %v101_v15, %v90_v59  ;;  %v111_v18 = vmax.f32 %v107_v16, 1e-15  ;;  %v124_v45 = vmin.f32 %v108_v14, 0.996 }
  0xdd   :  { %v334_v46 = vsub.f32 0.0, %v125_v44  ;;  %v306_v48 = vadd.f32 1.0, %v125_v44  ;;  %v309_v58 = vmul.f32 -0.5, %v125_v44  ;;  %v312_v11 = vand.u32 2147483647, %v125_v44 }
  0xde   :  { %v110_v19 = vmax.f32 %v106_v17, 1e-15  ;;  %v900_v47 = vsub.f32 0.0, %v124_v45  ;;  %v297_v49 = vadd.f32 1.0, %v124_v45  ;;  %v902_v50 = vmin.f32 %v111_v18, 0.996 }
  0xdf   :  { %v346_v51 = vadd.f32 1.0, %v334_v46  ;;  %v300_v57 = vmul.f32 -0.5, %v124_v45  ;;  %v349_v61 = vmul.f32 -0.5, %v334_v46  ;;  %v310_v4 = vadd.f32 1.0, %v309_v58 }
  0xe0   :  { %653 = vrcp.f32 %v110_v19  ;;  %v904_v52 = vmin.f32 %v110_v19, 0.996  ;;  %v337_v53 = vadd.f32 1.0, %v900_v47  ;;  %v908_v54 = vsub.f32 0.0, %v902_v50 }
  0xe1   :  { %655 = vrcp.f32 %v111_v18  ;;  %v324_v62 = vadd.f32 1.0, %v902_v50  ;;  %v301_v3 = vadd.f32 1.0, %v300_v57  ;;  %v303_v10 = vand.u32 2147483647, %v124_v45 }
  0xe2   :  { %657 = vlog2.f32 %v306_v48  ;;  %v911_v55 = vsub.f32 0.0, %v904_v52  ;;  %v315_v56 = vadd.f32 1.0, %v904_v52  ;;  %v364_v59 = vadd.f32 1.0, %v908_v54 }
  0xe3   :  { %659 = vlog2.f32 %v297_v49  ;;  %v302_v13 = vmul.f32 %v301_v3, %v124_v45  ;;  %v311_v14 = vmul.f32 %v310_v4, %v125_v44  ;;  %v318_v17 = vmul.f32 -0.5, %v904_v52 }
  0xe4   :  { %v650_v20 = vpop.eup %649  ;;  %661 = vlog2.f32 %v346_v51  ;;  %v355_v60 = vadd.f32 1.0, %v911_v55  ;;  %vm926_vm8 = vcmp.lt.f32.partialorder %v312_v11, 0.0004427343  ;;  %vm938_vm10 = vcmp.lt.f32.partialorder %v303_v10, 0.0004427343 }
  0xe5   :  { %v115_v21 = vmul.f32 0.996, %v650_v20  ;;  %663 = vlog2.f32 %v337_v53  ;;  %v343_v20 = vand.u32 2147483647, %v900_v47  ;;  %v321_v48 = vand.u32 2147483647, %v904_v52 }
  0xe6   :  { %v652_v22 = vpop.eup %651  ;;  %665 = vrcp.f32 %v125_v44 }
  0xe7   :  { %v113_v23 = vmul.f32 0.996, %v652_v22  ;;  %v121_v24 = vmin.f32 %v115_v21, 1.0  ;;  %667 = vlog2.f32 %v315_v56  ;;  %v327_v21 = vmul.f32 -0.5, %v902_v50 }
  0xe8   :  { %669 = vlog2.f32 %v364_v59  ;;  %vm946_vm11 = vcmp.lt.f32.partialorder %v343_v20, 0.0004427343  ;;  %vm979_vm14 = vcmp.lt.f32.partialorder %v321_v48, 0.0004427343 }
  0xe9   :  { %v120_v25 = vmin.f32 %v113_v23, 1.0  ;;  %v129_v26 = vmul.f32 %v121_v24, %v99_v63  ;;  %671 = vlog2.f32 %v355_v60 }
  0xea   :  { %v654_v27 = vpop.eup %653  ;;  %673 = vrcp.f32 %v124_v45 }
  0xeb   :  { %v128_v28 = vmul.f32 %v120_v25, %v97_v6  ;;  %v656_v29 = vpop.eup %655  ;;  %v133_v30 = vmul.f32 %v129_v26, %v864_v0  ;;  %v117_v31 = vmul.f32 0.996, %v654_v27  ;;  %v340_v6 = vmul.f32 -0.5, %v900_v47 }
  0xec   :  { %v119_v33 = vmul.f32 0.996, %v656_v29  ;;  %v658_v63 = vpop.eup %657  ;;  %675 = vlog2.f32 %v324_v62 }
  0xed   :  { %v132_v32 = vmul.f32 %v128_v28, %v866_v1  ;;  %v122_v34 = vmin.f32 %v117_v31, 1.0  ;;  %v660_v7 = vpop.eup %659  ;;  %v341_v16 = vadd.f32 1.0, %v340_v6  ;;  %v308_v22 = vmul.f32 0.6931472, %v658_v63 }
  0xee   :  { %v123_v35 = vmin.f32 %v119_v33, 1.0  ;;  %v662_v8 = vpop.eup %661  ;;  %v299_v23 = vmul.f32 0.6931472, %v660_v7  ;;  %v367_v28 = vmul.f32 -0.5, %v908_v54  ;;  %v358_v33 = vmul.f32 -0.5, %v911_v55 }
  0xef   :  { %566 = vmatprep.mubr.f32.mxu0 %v132_v32  ;;  %v130_v36 = vmul.f32 %v122_v34, %v101_v15  ;;  %v664_v9 = vpop.eup %663  ;;  %v352_v15 = vand.u32 2147483647, %v334_v46  ;;  %v348_v18 = vmul.f32 0.6931472, %v662_v8  ;;  %v342_v32 = vmul.f32 %v341_v16, %v900_v47 }
  0xf0   :  { %567 = vmatmul.mubr.f32.vlgmr.msra.gmra.mrb[0].mxu0 %v133_v30  ;;  %v131_v37 = vmul.f32 %v123_v35, %v103_v12  ;;  %v350_v12 = vadd.f32 1.0, %v349_v61  ;;  %v339_v24 = vmul.f32 0.6931472, %v664_v9  ;;  %v932_v29 = vpop.eup %665  ;;  %v319_v35 = vadd.f32 1.0, %v318_v17 }
  0xf1   :  { %v134_v38 = vmul.f32 %v130_v36, %v874_v5  ;;  %vm934_vm9 = vcmp.lt.f32.partialorder %v352_v15, 0.0004427343  ;;  %v668_v34 = vpop.eup %667  ;;  %v370_v47 = vand.u32 2147483647, %v908_v54  ;;  %v359_v57 = vadd.f32 1.0, %v358_v33 }
  0xf2   :  { %v135_v39 = vmul.f32 %v131_v37, %v868_v2  ;;  %v351_v27 = vmul.f32 %v350_v12, %v334_v46  ;;  %v368_v46 = vadd.f32 1.0, %v367_v28  ;;  %v317_v56 = vmul.f32 0.6931472, %v668_v34 }
  0xf3   :  { %569 = vmatprep.mubr.f32.mxu1 %v134_v38  ;;  %v330_v38 = vand.u32 2147483647, %v902_v50  ;;  %v361_v61 = vand.u32 2147483647, %v911_v55  ;;  %v320_v3 = vmul.f32 %v319_v35, %v904_v52  ;;  %vm974_vm13 = vcmp.lt.f32.partialorder %v370_v47, 0.0004427343 }
  0xf4   :  { %570 = vmatmul.mubr.f32.vlgmr.msra.gmra.mrb[0].mxu1 %v135_v39  ;;  %v354_v36 = vsel %vm934_vm9, %v351_v27, %v348_v18  ;;  %v670_v39 = vpop.eup %669  ;;  %v369_v6 = vmul.f32 %v368_v46, %v908_v54  ;;  %v360_v12 = vmul.f32 %v359_v57, %v911_v55 }
  0xf5   :  { %v672_v45 = vpop.eup %671  ;;  %v366_v60 = vmul.f32 0.6931472, %v670_v39  ;;  %vm968_vm12 = vcmp.lt.f32.partialorder %v330_v38, 0.0004427343  ;;  %v323_v11 = vsel %vm979_vm14, %v320_v3, %v317_v56  ;;  %vm989_vm15 = vcmp.lt.f32.partialorder %v361_v61, 0.0004427343 }
  0xf6   :  { %v674_v51 = vpop.eup %673  ;;  %v357_v4 = vmul.f32 0.6931472, %v672_v45 }
  0xf7   :  { %v676_v58 = vpop.eup %675  ;;  %v372_v15 = vsel %vm974_vm13, %v369_v6, %v366_v60 }
  0xf8   :  { %v326_v10 = vmul.f32 0.6931472, %v676_v58  ;;  %v363_v55 = vsel %vm989_vm15, %v360_v12, %v357_v4 }
  0xf9   :  { %v375_v30 = vsub.f32 %v323_v11, %v363_v55 }
  0xfb   :  { %v379_v56 = vmul.f32 0.5, %v375_v30 }
 0x1c3   :  { %v884_v40 = vpop.f32.mrb[0].mxu0 }
 0x1c4   :  { %v886_v41 = vpop.f32.mrb[1].mxu0  ;;  %v238_v0 = vmul.f32 %v884_v40, %v884_v40 }
 0x1c5   :  { %v237_v1 = vmul.f32 %v886_v41, %v886_v41 }
 0x1c6   :  { %243 = vadd.xlane.f32.xlu1 %v238_v0  ;;  %v314_v0 = vsel %vm926_vm8, %v311_v14, %v308_v22 }
 0x1c7   :  { %241 = vadd.xlane.f32.xlu0 %v237_v1  ;;  %v892_v42 = vpop.f32.mrb[0].mxu1  ;;  %v305_v1 = vsel %vm938_vm10, %v302_v13, %v299_v23  ;;  %v374_v53 = vsub.f32 %v314_v0, %v354_v36 }
 0x1c8   :  { %v894_v43 = vpop.f32.mrb[1].mxu1  ;;  %v240_v2 = vmul.f32 %v892_v42, %v892_v42 }
 0x1c9   :  { %v239_v5 = vmul.f32 %v894_v43, %v894_v43  ;;  %v378_v9 = vmul.f32 0.5, %v374_v53 }
 0x1ca   :  { %247 = vadd.xlane.f32.xlu1 %v240_v2  ;;  %v345_v2 = vsel %vm946_vm11, %v342_v32, %v339_v24 }
 0x1cb   :  { %245 = vadd.xlane.f32.xlu0 %v239_v5  ;;  %v328_v5 = vadd.f32 1.0, %v327_v21  ;;  %v373_v59 = vsub.f32 %v305_v1, %v345_v2 }
 0x1cd   :  { %v329_v62 = vmul.f32 %v328_v5, %v902_v50  ;;  %v377_v14 = vmul.f32 0.5, %v373_v59 }
 0x1cf   :  { %v332_v23 = vsel %vm968_vm12, %v329_v62, %v326_v10 }
 0x1d0   :  { %v376_v28 = vsub.f32 %v332_v23, %v372_v15 }
 0x253   :  { %v919_v19 = vpop.xlane.xlu1 %243 }
 0x254   :  { %677 = vrsqrt.f32 %v919_v19  ;;  %v924_v25 = vpop.xlane.xlu0 %241  ;;  %vm258_vm0 = vcmp.eq.f32.partialorder %v919_v19, inf  ;;  %v261_v16 = vand.u32 2147483648, %v919_v19  ;;  %vm260_vm1 = vcmp.eq.f32.partialorder %v919_v19, 0.0 }
 0x255   :  { %679 = vrsqrt.f32 %v924_v25  ;;  %vm251_vm2 = vcmp.eq.f32.partialorder %v924_v25, inf  ;;  %v254_v20 = vand.u32 2147483648, %v924_v25  ;;  %vm253_vm3 = vcmp.eq.f32.partialorder %v924_v25, 0.0 }
 0x257   :  { %v957_v44 = vpop.xlane.xlu1 %247 }
 0x258   :  { %681 = vrsqrt.f32 %v957_v44  ;;  %v962_v49 = vpop.xlane.xlu0 %245  ;;  %vm272_vm4 = vcmp.eq.f32.partialorder %v957_v44, inf  ;;  %vm274_vm5 = vcmp.eq.f32.partialorder %v957_v44, 0.0  ;;  %v275_v36 = vand.u32 2147483648, %v957_v44 }
 0x259   :  { %683 = vrsqrt.f32 %v962_v49  ;;  %vm265_vm6 = vcmp.eq.f32.partialorder %v962_v49, inf  ;;  %vm267_vm7 = vcmp.eq.f32.partialorder %v962_v49, 0.0  ;;  %v268_v0 = vand.u32 2147483648, %v962_v49 }
 0x25a   :  { %685 = vrcp.f32 %v902_v50 }
 0x25b   :  { %687 = vrcp.f32 %v904_v52 }
 0x25e   :  { %v678_v50 = vpop.eup %677 }
 0x25f   :  { %v680_v13 = vpop.eup %679  ;;  %v257_v54 = vmul.f32 %v678_v50, %v919_v19 }
 0x260   :  { %v250_v17 = vmul.f32 %v680_v13, %v924_v25 }
 0x261   :  { %v259_v18 = vsel %vm258_vm0, %v919_v19, %v257_v54 }
 0x262   :  { %v262_v21 = vsel %vm260_vm1, %v261_v16, %v259_v18  ;;  %v252_v22 = vsel %vm251_vm2, %v924_v25, %v250_v17  ;;  %v682_v24 = vpop.eup %681 }
 0x263   :  { %v278_v26 = vmax.f32 %v262_v21, 1e-15  ;;  %v255_v27 = vsel %vm253_vm3, %v254_v20, %v252_v22  ;;  %v684_v31 = vpop.eup %683  ;;  %v271_v33 = vmul.f32 %v682_v24, %v957_v44 }
 0x264   :  { %v277_v32 = vmax.f32 %v255_v27, 1e-15  ;;  %v686_v34 = vpop.eup %685  ;;  %v264_v37 = vmul.f32 %v684_v31, %v962_v49 }
 0x265   :  { %v284_v35 = vmul.f32 %v932_v29, %v278_v26  ;;  %v273_v39 = vsel %vm272_vm4, %v957_v44, %v271_v33  ;;  %v688_v1 = vpop.eup %687  ;;  %689 = vrcp.f32 %v278_v26 }
 0x266   :  { %v282_v38 = vmul.f32 %v674_v51, %v277_v32  ;;  %v276_v5 = vsel %vm274_vm5, %v275_v36, %v273_v39  ;;  %v266_v29 = vsel %vm265_vm6, %v962_v49, %v264_v37  ;;  %691 = vrcp.f32 %v277_v32 }
 0x267   :  { %v382_v2 = vmul.f32 %v378_v9, %v284_v35  ;;  %v280_v46 = vmax.f32 %v276_v5, 1e-15  ;;  %v269_v47 = vsel %vm267_vm7, %v268_v0, %v266_v29  ;;  %v380_v51 = vmul.f32 0.5, %v376_v28 }
 0x268   :  { %v381_v45 = vmul.f32 %v377_v14, %v282_v38  ;;  %v279_v48 = vmax.f32 %v269_v47, 1e-15 }
 0x269   :  { %693 = vtanh.f32 %v382_v2  ;;  %v288_v53 = vmul.f32 %v686_v34, %v280_v46 }
 0x26a   :  { %695 = vtanh.f32 %v381_v45  ;;  %v286_v57 = vmul.f32 %v688_v1, %v279_v48 }
 0x26b   :  { %v384_v58 = vmul.f32 %v380_v51, %v288_v53  ;;  %697 = vrcp.f32 %v280_v46 }
 0x26c   :  { %v383_v59 = vmul.f32 %v379_v56, %v286_v57  ;;  %699 = vrcp.f32 %v279_v48 }
 0x26d   :  { %701 = vtanh.f32 %v384_v58 }
 0x26e   :  { %703 = vtanh.f32 %v383_v59 }
 0x26f   :  { %v690_v60 = vpop.eup %689 }
 0x270   :  { %v692_v61 = vpop.eup %691 }
 0x273   :  { %v694_v62 = vpop.eup %693 }
 0x274   :  { %v696_v63 = vpop.eup %695  ;;  %v392_v3 = vmul.f32 %v694_v62, %v690_v60 }
 0x275   :  { %v390_v4 = vmul.f32 %v696_v63, %v692_v61  ;;  %v698_v6 = vpop.eup %697 }
 0x276   :  { %v1027_v7 = vsel %vm260_vm1, 0.0, %v392_v3  ;;  %v700_v8 = vpop.eup %699 }
 0x277   :  { %v406_v50 = vmul.f32 %v1027_v7, %v278_v26  ;;  %v1032_v9 = vsel %vm253_vm3, 0.0, %v390_v4  ;;  %v702_v10 = vpop.eup %701 }
 0x278   :  { %v405_v11 = vmul.f32 %v1032_v9, %v277_v32  ;;  %v704_v12 = vpop.eup %703  ;;  %v396_v54 = vmul.f32 %v702_v10, %v698_v6 }
 0x279   :  { %v410_v13 = vmax.f32 %v406_v50, 1e-15  ;;  %v394_v15 = vmul.f32 %v704_v12, %v700_v8 }
 0x27a   :  { %v409_v14 = vmax.f32 %v405_v11, 1e-15  ;;  %v1037_v19 = vsel %vm274_vm5, 0.0, %v396_v54 }
 0x27b   :  { %v426_v52 = vmin.f32 %v410_v13, 0.996  ;;  %v408_v17 = vmul.f32 %v1037_v19, %v280_v46  ;;  %v1042_v25 = vsel %vm267_vm7, 0.0, %v394_v15 }
 0x27c   :  { %v425_v16 = vmin.f32 %v409_v14, 0.996  ;;  %v407_v55 = vmul.f32 %v1042_v25, %v279_v48 }
 0x27d   :  { %705 = vtanh.f32 %v426_v52  ;;  %v412_v18 = vmax.f32 %v408_v17, 1e-15 }
 0x27e   :  { %707 = vrcp.f32 %v426_v52  ;;  %v411_v20 = vmax.f32 %v407_v55, 1e-15 }
 0x27f   :  { %709 = vtanh.f32 %v425_v16  ;;  %v428_v21 = vmin.f32 %v412_v18, 0.996 }
 0x280   :  { %711 = vrcp.f32 %v425_v16  ;;  %v427_v44 = vmin.f32 %v411_v20, 0.996 }
 0x281   :  { %713 = vrcp.f32 %v410_v13 }
 0x282   :  { %715 = vtanh.f32 %v428_v21 }
 0x283   :  { %717 = vrcp.f32 %v428_v21 }
 0x284   :  { %719 = vrcp.f32 %v409_v14 }
 0x285   :  { %721 = vtanh.f32 %v427_v44 }
 0x286   :  { %723 = vrcp.f32 %v427_v44 }
 0x287   :  { %v706_v22 = vpop.eup %705  ;;  %725 = vrcp.f32 %v412_v18 }
 0x288   :  { %v708_v49 = vpop.eup %707  ;;  %727 = vrcp.f32 %v411_v20 }
 0x289   :  { %v710_v23 = vpop.eup %709  ;;  %v436_v24 = vmul.f32 %v708_v49, %v706_v22 }
 0x28a   :  { %v712_v26 = vpop.eup %711 }
 0x28b   :  { %v714_v27 = vpop.eup %713  ;;  %v442_v28 = vmul.f32 %v436_v24, %v426_v52  ;;  %v434_v30 = vmul.f32 %v712_v26, %v710_v23 }
 0x28c   :  { %v716_v31 = vpop.eup %715  ;;  %v416_v0 = vmul.f32 0.996, %v714_v27 }
 0x28d   :  { %v718_v32 = vpop.eup %717  ;;  %v441_v33 = vmul.f32 %v434_v30, %v425_v16  ;;  %v446_v34 = vmax.f32 %v442_v28, 1e-15 }
 0x28e   :  { %v720_v35 = vpop.eup %719  ;;  %v440_v36 = vmul.f32 %v718_v32, %v716_v31  ;;  %v422_v47 = vmin.f32 %v416_v0, 1.0 }
 0x28f   :  { %v722_v37 = vpop.eup %721  ;;  %v445_v38 = vmax.f32 %v441_v33, 1e-15  ;;  %729 = vrcp.f32 %v446_v34  ;;  %v414_v29 = vmul.f32 0.996, %v720_v35 }
 0x290   :  { %v724_v39 = vpop.eup %723  ;;  %v444_v1 = vmul.f32 %v440_v36, %v428_v21  ;;  %v462_v57 = vmul.f32 %v422_v47, %v1027_v7  ;;  %v513_v7 = vld [vmem:[%s1073_s2] ss:$0 sm:$0xff]  ;;  %s813_s2 = smov [#allocation7]  }
 0x291   :  { %v438_v2 = vmul.f32 %v724_v39, %v722_v37  ;;  %731 = vrcp.f32 %v445_v38  ;;  %v726_v5 = vpop.eup %725  ;;  %v421_v56 = vmin.f32 %v414_v29, 1.0  ;;  %s496_s11 = sshll.u32 %s813_s2, 4  ;;  %s497_s11 = int_to_ptr.vmem [resolvable:$true] %s496_s11 }
 0x292   :  { %v448_v45 = vmax.f32 %v444_v1, 1e-15  ;;  %v728_v48 = vpop.eup %727  ;;  %v420_v51 = vmul.f32 0.996, %v726_v5  ;;  %v466_v3 = vmul.f32 %v462_v57, %v436_v24  ;;  %s781_s12 = scalar_lea.vmem %s497_s11, 512  ;;  %p786_p3 = scmp.lt.s32.totalorder %s497_s11, %s497_s11 }
 0x293   :  { %v443_v46 = vmul.f32 %v438_v2, %v427_v44  ;;  %v418_v58 = vmul.f32 0.996, %v728_v48  ;;  %v461_v61 = vmul.f32 %v421_v56, %v1032_v9  ;;  %p782_p2 = scmp.ne.s32.totalorder %s497_s11, %s781_s12  ;;  %p787_p4 = scmp.lt.s32.totalorder %s781_s12, %s781_s12 }
 0x294   :  { %733 = vrcp.f32 %v448_v45  ;;  %v424_v60 = vmin.f32 %v420_v51, 1.0 }
 0x295   :  { %v447_v53 = vmax.f32 %v443_v46, 1e-15  ;;  %v423_v4 = vmin.f32 %v418_v58, 1.0  ;;  %v465_v11 = vmul.f32 %v461_v61, %v434_v30  ;;  %p788_p5 = por %p787_p4, %p786_p3 }
 0x296   :  { %v464_v50 = vmul.f32 %v424_v60, %v1037_v19 }
 0x297   :  { %735 = vrcp.f32 %v447_v53  ;;  %v463_v14 = vmul.f32 %v423_v4, %v1042_v25  ;;  %p789_p6 = pnand %p788_p5, %p782_p2 }
 0x298   :  { %v468_v16 = vmul.f32 %v464_v50, %v440_v36 }
 0x299   :  { %v730_v59 = vpop.eup %729  ;;  %v467_v21 = vmul.f32 %v463_v14, %v438_v2 }
 0x29a   :  { %v452_v62 = vmul.f32 0.996, %v730_v59 }
 0x29b   :  { %v732_v63 = vpop.eup %731 }
 0x29c   :  { %v450_v6 = vmul.f32 0.996, %v732_v63  ;;  %v458_v8 = vmin.f32 %v452_v62, 1.0 }
 0x29e   :  { %v734_v10 = vpop.eup %733  ;;  %v457_v12 = vmin.f32 %v450_v6, 1.0  ;;  %v470_v13 = vmul.f32 %v466_v3, %v458_v8 }
 0x29f   :  { %v456_v54 = vmul.f32 0.996, %v734_v10 }
 0x2a0   :  { %v469_v9 = vmul.f32 %v465_v11, %v457_v12  ;;  %v474_v15 = vmul.f32 %v884_v40, %v470_v13 }
 0x2a1   :  { %v736_v52 = vpop.eup %735  ;;  %v460_v17 = vmin.f32 %v456_v54, 1.0 }
 0x2a2   :  { %v454_v55 = vmul.f32 0.996, %v736_v52  ;;  %v473_v19 = vmul.f32 %v469_v9, %v886_v41  ;;  %v484_v18 = vadd.f32 %v513_v7, %v474_v15 }
 0x2a3   :  { %v472_v20 = vmul.f32 %v468_v16, %v460_v17 }
 0x2a4   :  { %v459_v44 = vmin.f32 %v454_v55, 1.0  ;;  %v483_v22 = vadd.f32 %v513_v7, %v473_v19  ;;  %488 = vst [vmem:[#allocation7 + $0x8] sm:$0xff] %v484_v18 }
 0x2a5   :  { %v476_v49 = vmul.f32 %v892_v42, %v472_v20 }
 0x2a6   :  { %v471_v23 = vmul.f32 %v467_v21, %v459_v44  ;;  %487 = vst [vmem:[#allocation7] sm:$0xff] %v483_v22 }
 0x2a7   :  { %v486_v25 = vadd.f32 %v513_v7, %v476_v49 }
 0x2a8   :  { %v475_v40 = vmul.f32 %v471_v23, %v894_v43 }
 0x2a9   :  { %490 = vst [vmem:[#allocation7 + $0x18] sm:$0xff] %v486_v25 }
 0x2aa   :  { %v485_v24 = vadd.f32 %v513_v7, %v475_v40 }
 0x2ac   :  { %489 = vst [vmem:[#allocation7 + $0x10] sm:$0xff] %v485_v24 }
 0x2ad   :  { %792 = shalt.err (!%p789_p6)
}
 0x2ae   :  { %s793_s15 = scalar_lea.hbm %s1074_s3, 512 }
 0x2af   :  { %p794_p7 = scmp.ne.s32.totalorder %s1074_s3, %s793_s15  ;;  %p797_p8 = scmp.lt.u32.totalorder %s793_s15, %s1074_s3 }
 0x2b1   :  { %p799_p9 = pnand %p797_p8, %p794_p7 }
 0x2b3   :  { %802 = shalt.err (!%p799_p9)
}
 0x2b4   :  { %502 = dma.vmem_to_hbm [thread:$0]  %s497_s11, 512, %s1074_s3, [#allocation4], %s810_s22, %s810_s22, %s811_s23  }
 0x2b5   :  { %807 = dma.done.wait [#allocation4], 512  }
 0x2b6   :  { %808 = vsyncadd [#allocation4], 4294966784 }
 0x2b7   :  { %506 = vsyncpa [#allocation3], 1 }
 0x2b8   :  { %507 = vsyncpa [#allocation6], 1 }
 0x2b9   :  { %508 = vsyncpa [#allocation4], 1 }

// kernel: tpu_custom_call.1
= control target key start
LH: loop header
LB: loop body
LE: loop exit
PB: predicated region body
PF: predicated region fallthrough
CT: control target
= control target key end

     0   :  { %8 = vsyncpa [#allocation3], 0  ;;  %s1071_s0 = inlined_call_operand.hbm [shape: f32[32,128], index: 0, kind: input, shape index: {}]   ;;  %s1072_s1 = inlined_call_operand.hbm [shape: f32[128,128], index: 1, kind: input, shape index: {}]   ;;  %s1073_s2 = inlined_call_operand.vmem [shape: f32[1,128], index: 2, kind: input, shape index: {}]   ;;  %s1074_s3 = inlined_call_operand.hbm [shape: f32[32,128], index: 3, kind: output, shape index: {}]  }
   0x1   :  { %9 = vsyncpa [#allocation6], 0 }
   0x2   :  { %10 = vsyncpa [#allocation4], 0  ;;  %s809_s12 = smov [#allocation2]   ;;  %s737_s16 = scalar_lea.hbm %s1071_s0, 512 }
   0x3   :  { %s16_s13 = sshll.u32 %s809_s12, 4  ;;  %p738_p0 = scmp.ne.s32.totalorder %s1071_s0, %s737_s16  ;;  %s17_s13 = int_to_ptr.vmem [resolvable:$true] %s16_s13 }
   0x4   :  { %p741_p1 = scmp.lt.u32.totalorder %s737_s16, %s1071_s0 }
   0x6   :  { %p743_p2 = pnand %p741_p1, %p738_p0 }
   0x8   :  { %746 = shalt.err (!%p743_p2)
}
   0x9   :  { %s747_s21 = scalar_lea.vmem %s17_s13, 512  ;;  %p752_p4 = scmp.lt.s32.totalorder %s17_s13, %s17_s13 }
   0xa   :  { %p748_p3 = scmp.ne.s32.totalorder %s17_s13, %s747_s21  ;;  %p753_p5 = scmp.lt.s32.totalorder %s747_s21, %s747_s21 }
   0xc   :  { %p754_p6 = por %p753_p5, %p752_p4 }
   0xe   :  { %p755_p7 = pnand %p754_p6, %p748_p3 }
  0x10   :  { %758 = shalt.err (!%p755_p7)
}
  0x11   :  { %s810_s22 = smov 128   ;;  %s811_s23 = smov 8  }
  0x12   :  { %22 = dma.hbm_to_vmem [thread:$0]  %s1071_s0, 512, %s17_s13, [#allocation3], %s810_s22, %s810_s22, %s811_s23  }
  0x13   :  { %s812_s26 = smov [#allocation5]   ;;  %s759_s30 = scalar_lea.hbm %s1072_s1, 2048 }
  0x14   :  { %s28_s27 = sshll.u32 %s812_s26, 4  ;;  %p760_p8 = scmp.ne.s32.totalorder %s1072_s1, %s759_s30  ;;  %s29_s27 = int_to_ptr.vmem [resolvable:$true] %s28_s27 }
  0x15   :  { %p763_p9 = scmp.lt.u32.totalorder %s759_s30, %s1072_s1 }
  0x17   :  { %p765_p10 = pnand %p763_p9, %p760_p8 }
  0x19   :  { %768 = shalt.err (!%p765_p10)
}
  0x1a   :  { %s769_s8 = scalar_lea.vmem %s29_s27, 2048  ;;  %p774_p12 = scmp.lt.s32.totalorder %s29_s27, %s29_s27 }
  0x1b   :  { %p770_p11 = scmp.ne.s32.totalorder %s29_s27, %s769_s8  ;;  %p775_p13 = scmp.lt.s32.totalorder %s769_s8, %s769_s8 }
  0x1d   :  { %p776_p0 = por %p775_p13, %p774_p12 }
  0x1f   :  { %p777_p1 = pnand %p776_p0, %p770_p11 }
  0x21   :  { %780 = shalt.err (!%p777_p1)
}
  0x22   :  { %34 = dma.hbm_to_vmem [thread:$0]  %s1072_s1, 2048, %s29_s27, [#allocation6], %s810_s22, %s810_s22, %s811_s23  }
  0x23   :  { %803 = dma.done.wait [#allocation3], 512  }
  0x24   :  { %804 = vsyncadd [#allocation3], 4294966784 }
  0x25   :  { %805 = dma.done.wait [#allocation6], 2048  }
  0x26   :  { %806 = vsyncadd [#allocation6], 4294965248  ;;  %v864_v0 = vld [vmem:[#allocation2 + $0x8] sm:$0xff]  ;;  %v866_v1 = vld [vmem:[#allocation2] sm:$0xff] }
  0x27   :  { %v868_v2 = vld [vmem:[#allocation2 + $0x18] sm:$0xff]  ;;  %v49_v3 = vmul.f32 %v864_v0, %v864_v0  ;;  %v48_v4 = vmul.f32 %v866_v1, %v866_v1  ;;  %v874_v5 = vld [vmem:[#allocation2 + $0x10] sm:$0xff]  ;;  %v136_v8 = vld [vmem:[#allocation5] sm:$0xff] }
  0x28   :  { %v51_v6 = vmul.f32 %v868_v2, %v868_v2  ;;  %v50_v7 = vmul.f32 %v874_v5, %v874_v5  ;;  %v137_v9 = vld [vmem:[#allocation5 + $0x8] sm:$0xff]  ;;  %v138_v11 = vld [vmem:[#allocation5 + $0x10] sm:$0xff]  ;;  %v139_v12 = vld [vmem:[#allocation5 + $0x18] sm:$0xff] }
  0x29   :  { %54 = vadd.xlane.f32.xlu1 %v49_v3  ;;  %52 = vadd.xlane.f32.xlu0 %v48_v4  ;;  %v572_v10 = vpack.c.bf16 %v137_v9, %v136_v8  ;;  %v140_v13 = vld [vmem:[#allocation5 + $0x20] sm:$0xff]  ;;  %v576_v14 = vpack.c.bf16 %v139_v12, %v138_v11  ;;  %v141_v15 = vld [vmem:[#allocation5 + $0x28] sm:$0xff]  ;;  %v142_v17 = vld [vmem:[#allocation5 + $0x30] sm:$0xff] }
  0x2a   :  { %v580_v16 = vpack.c.bf16 %v141_v15, %v140_v13  ;;  %v143_v18 = vld [vmem:[#allocation5 + $0x38] sm:$0xff]  ;;  %v144_v20 = vld [vmem:[#allocation5 + $0x40] sm:$0xff]  ;;  %v145_v21 = vld [vmem:[#allocation5 + $0x48] sm:$0xff] }
  0x2b   :  { %573 = vmatprep.subr.bf16.mxu0 %v572_v10  ;;  %604 = vmatprep.subr.bf16.mxu1 %v572_v10  ;;  %v584_v19 = vpack.c.bf16 %v143_v18, %v142_v17  ;;  %v588_v22 = vpack.c.bf16 %v145_v21, %v144_v20  ;;  %v146_v23 = vld [vmem:[#allocation5 + $0x50] sm:$0xff]  ;;  %v147_v24 = vld [vmem:[#allocation5 + $0x58] sm:$0xff]  ;;  %v148_v26 = vld [vmem:[#allocation5 + $0x60] sm:$0xff] }
  0x2c   :  { %575 = vmatpush3.bf16.msra.mxu0 %v572_v10  ;;  %612 = vmatpush3.bf16.msra.mxu1 %v572_v10  ;;  %v592_v25 = vpack.c.bf16 %v147_v24, %v146_v23  ;;  %v149_v27 = vld [vmem:[#allocation5 + $0x68] sm:$0xff]  ;;  %v150_v29 = vld [vmem:[#allocation5 + $0x70] sm:$0xff]  ;;  %v151_v30 = vld [vmem:[#allocation5 + $0x78] sm:$0xff] }
  0x2d   :  { %58 = vadd.xlane.f32.xlu1 %v51_v6  ;;  %56 = vadd.xlane.f32.xlu0 %v50_v7  ;;  %v596_v28 = vpack.c.bf16 %v149_v27, %v148_v26  ;;  %v600_v31 = vpack.c.bf16 %v151_v30, %v150_v29 }
  0x2e   :  { %577 = vmatprep.subr.bf16.mxu0 %v576_v14  ;;  %605 = vmatprep.subr.bf16.mxu1 %v576_v14 }
  0x30   :  { %579 = vmatpush3.bf16.msra.mxu0 %v576_v14  ;;  %613 = vmatpush3.bf16.msra.mxu1 %v576_v14 }
  0x31   :  { %581 = vmatprep.subr.bf16.mxu0 %v580_v16  ;;  %606 = vmatprep.subr.bf16.mxu1 %v580_v16 }
  0x34   :  { %583 = vmatpush3.bf16.msra.mxu0 %v580_v16  ;;  %614 = vmatpush3.bf16.msra.mxu1 %v580_v16 }
  0x35   :  { %585 = vmatprep.subr.bf16.mxu0 %v584_v19  ;;  %607 = vmatprep.subr.bf16.mxu1 %v584_v19 }
  0x38   :  { %587 = vmatpush3.bf16.msra.mxu0 %v584_v19  ;;  %615 = vmatpush3.bf16.msra.mxu1 %v584_v19 }
  0x39   :  { %589 = vmatprep.subr.bf16.mxu0 %v588_v22  ;;  %608 = vmatprep.subr.bf16.mxu1 %v588_v22 }
  0x3c   :  { %591 = vmatpush3.bf16.msra.mxu0 %v588_v22  ;;  %616 = vmatpush3.bf16.msra.mxu1 %v588_v22 }
  0x3d   :  { %593 = vmatprep.subr.bf16.mxu0 %v592_v25  ;;  %609 = vmatprep.subr.bf16.mxu1 %v592_v25 }
  0x40   :  { %595 = vmatpush3.bf16.msra.mxu0 %v592_v25  ;;  %617 = vmatpush3.bf16.msra.mxu1 %v592_v25 }
  0x41   :  { %597 = vmatprep.subr.bf16.mxu0 %v596_v28  ;;  %610 = vmatprep.subr.bf16.mxu1 %v596_v28 }
  0x44   :  { %599 = vmatpush3.bf16.msra.mxu0 %v596_v28  ;;  %618 = vmatpush3.bf16.msra.mxu1 %v596_v28 }
  0x45   :  { %601 = vmatprep.subr.bf16.mxu0 %v600_v31  ;;  %611 = vmatprep.subr.bf16.mxu1 %v600_v31 }
  0x48   :  { %603 = vmatpush3.bf16.msra.mxu0 %v600_v31  ;;  %619 = vmatpush3.bf16.msra.mxu1 %v600_v31 }
  0xb6   :  { %v55_v32 = vpop.xlane.xlu1 %54  ;;  %v53_v33 = vpop.xlane.xlu0 %52 }
  0xb7   :  { %625 = vrsqrt.f32 %v55_v32  ;;  %vm69_vm0 = vcmp.eq.f32.partialorder %v55_v32, inf  ;;  %v72_v39 = vand.u32 2147483648, %v55_v32  ;;  %vm71_vm1 = vcmp.eq.f32.partialorder %v55_v32, 0.0 }
  0xb8   :  { %627 = vrsqrt.f32 %v53_v33  ;;  %vm62_vm2 = vcmp.eq.f32.partialorder %v53_v33, inf  ;;  %v65_v42 = vand.u32 2147483648, %v53_v33  ;;  %vm64_vm3 = vcmp.eq.f32.partialorder %v53_v33, 0.0 }
  0xba   :  { %v59_v34 = vpop.xlane.xlu1 %58  ;;  %v57_v35 = vpop.xlane.xlu0 %56 }
  0xbb   :  { %629 = vrsqrt.f32 %v59_v34  ;;  %vm83_vm4 = vcmp.eq.f32.partialorder %v59_v34, inf  ;;  %vm85_vm5 = vcmp.eq.f32.partialorder %v59_v34, 0.0  ;;  %v86_v50 = vand.u32 2147483648, %v59_v34 }
  0xbc   :  { %631 = vrsqrt.f32 %v57_v35  ;;  %vm76_vm6 = vcmp.eq.f32.partialorder %v57_v35, inf  ;;  %v79_v54 = vand.u32 2147483648, %v57_v35  ;;  %vm78_vm7 = vcmp.eq.f32.partialorder %v57_v35, 0.0 }
  0xc1   :  { %v626_v36 = vpop.eup %625 }
  0xc2   :  { %v628_v37 = vpop.eup %627  ;;  %v68_v38 = vmul.f32 %v626_v36, %v55_v32 }
  0xc3   :  { %v61_v40 = vmul.f32 %v628_v37, %v53_v33 }
  0xc4   :  { %v70_v41 = vsel %vm69_vm0, %v55_v32, %v68_v38 }
  0xc5   :  { %v630_v43 = vpop.eup %629  ;;  %v73_v44 = vsel %vm71_vm1, %v72_v39, %v70_v41  ;;  %v63_v45 = vsel %vm62_vm2, %v53_v33, %v61_v40 }
  0xc6   :  { %v632_v46 = vpop.eup %631  ;;  %v89_v47 = vmax.f32 %v73_v44, 1e-15  ;;  %v82_v48 = vmul.f32 %v630_v43, %v59_v34  ;;  %v66_v49 = vsel %vm64_vm3, %v65_v42, %v63_v45 }
  0xc7   :  { %v75_v51 = vmul.f32 %v632_v46, %v57_v35  ;;  %v88_v52 = vmax.f32 %v66_v49, 1e-15 }
  0xc8   :  { %633 = vtanh.f32 %v89_v47  ;;  %v84_v53 = vsel %vm83_vm4, %v59_v34, %v82_v48 }
  0xc9   :  { %635 = vrcp.f32 %v89_v47  ;;  %v87_v55 = vsel %vm85_vm5, %v86_v50, %v84_v53  ;;  %v77_v56 = vsel %vm76_vm6, %v57_v35, %v75_v51 }
  0xca   :  { %v91_v57 = vmax.f32 %v87_v55, 1e-15  ;;  %637 = vtanh.f32 %v88_v52  ;;  %v80_v58 = vsel %vm78_vm7, %v79_v54, %v77_v56 }
  0xcb   :  { %639 = vrcp.f32 %v88_v52  ;;  %v90_v59 = vmax.f32 %v80_v58, 1e-15 }
  0xcc   :  { %641 = vtanh.f32 %v91_v57 }
  0xcd   :  { %643 = vrcp.f32 %v91_v57 }
  0xce   :  { %645 = vtanh.f32 %v90_v59 }
  0xcf   :  { %647 = vrcp.f32 %v90_v59 }
  0xd2   :  { %v634_v60 = vpop.eup %633 }
  0xd3   :  { %v636_v61 = vpop.eup %635 }
  0xd4   :  { %v638_v62 = vpop.eup %637  ;;  %v99_v63 = vmul.f32 %v636_v61, %v634_v60 }
  0xd5   :  { %v640_v3 = vpop.eup %639 }
  0xd6   :  { %v642_v4 = vpop.eup %641  ;;  %v97_v6 = vmul.f32 %v640_v3, %v638_v62  ;;  %v105_v7 = vmul.f32 %v99_v63, %v89_v47 }
  0xd7   :  { %v644_v8 = vpop.eup %643 }
  0xd8   :  { %v646_v9 = vpop.eup %645  ;;  %v104_v10 = vmul.f32 %v97_v6, %v88_v52  ;;  %v109_v11 = vmax.f32 %v105_v7, 1e-15  ;;  %v103_v12 = vmul.f32 %v644_v8, %v642_v4 }
  0xd9   :  { %v648_v13 = vpop.eup %647 }
  0xda   :  { %v108_v14 = vmax.f32 %v104_v10, 1e-15  ;;  %649 = vrcp.f32 %v109_v11  ;;  %v101_v15 = vmul.f32 %v648_v13, %v646_v9  ;;  %v107_v16 = vmul.f32 %v103_v12, %v91_v57 }
  0xdb   :  { %v125_v44 = vmin.f32 %v109_v11, 0.996 }
  0xdc   :  { %651 = vrcp.f32 %v108_v14  ;;  %v106_v17 = vmul.f32 %v101_v15, %v90_v59  ;;  %v111_v18 = vmax.f32 %v107_v16, 1e-15  ;;  %v124_v45 = vmin.f32 %v108_v14, 0.996 }
  0xdd   :  { %v334_v46 = vsub.f32 0.0, %v125_v44  ;;  %v306_v48 = vadd.f32 1.0, %v125_v44  ;;  %v309_v58 = vmul.f32 -0.5, %v125_v44  ;;  %v312_v11 = vand.u32 2147483647, %v125_v44 }
  0xde   :  { %v110_v19 = vmax.f32 %v106_v17, 1e-15  ;;  %v900_v47 = vsub.f32 0.0, %v124_v45  ;;  %v297_v49 = vadd.f32 1.0, %v124_v45  ;;  %v902_v50 = vmin.f32 %v111_v18, 0.996 }
  0xdf   :  { %v346_v51 = vadd.f32 1.0, %v334_v46  ;;  %v300_v57 = vmul.f32 -0.5, %v124_v45  ;;  %v349_v61 = vmul.f32 -0.5, %v334_v46  ;;  %v310_v4 = vadd.f32 1.0, %v309_v58 }
  0xe0   :  { %653 = vrcp.f32 %v110_v19  ;;  %v904_v52 = vmin.f32 %v110_v19, 0.996  ;;  %v337_v53 = vadd.f32 1.0, %v900_v47  ;;  %v908_v54 = vsub.f32 0.0, %v902_v50 }
  0xe1   :  { %655 = vrcp.f32 %v111_v18  ;;  %v324_v62 = vadd.f32 1.0, %v902_v50  ;;  %v301_v3 = vadd.f32 1.0, %v300_v57  ;;  %v303_v10 = vand.u32 2147483647, %v124_v45 }
  0xe2   :  { %657 = vlog2.f32 %v306_v48  ;;  %v911_v55 = vsub.f32 0.0, %v904_v52  ;;  %v315_v56 = vadd.f32 1.0, %v904_v52  ;;  %v364_v59 = vadd.f32 1.0, %v908_v54 }
  0xe3   :  { %659 = vlog2.f32 %v297_v49  ;;  %v302_v13 = vmul.f32 %v301_v3, %v124_v45  ;;  %v311_v14 = vmul.f32 %v310_v4, %v125_v44  ;;  %v318_v17 = vmul.f32 -0.5, %v904_v52 }
  0xe4   :  { %v650_v20 = vpop.eup %649  ;;  %661 = vlog2.f32 %v346_v51  ;;  %v355_v60 = vadd.f32 1.0, %v911_v55  ;;  %vm926_vm8 = vcmp.lt.f32.partialorder %v312_v11, 0.0004427343  ;;  %vm938_vm10 = vcmp.lt.f32.partialorder %v303_v10, 0.0004427343 }
  0xe5   :  { %v115_v21 = vmul.f32 0.996, %v650_v20  ;;  %663 = vlog2.f32 %v337_v53  ;;  %v343_v20 = vand.u32 2147483647, %v900_v47  ;;  %v321_v48 = vand.u32 2147483647, %v904_v52 }
  0xe6   :  { %v652_v22 = vpop.eup %651  ;;  %665 = vrcp.f32 %v125_v44 }
  0xe7   :  { %v113_v23 = vmul.f32 0.996, %v652_v22  ;;  %v121_v24 = vmin.f32 %v115_v21, 1.0  ;;  %667 = vlog2.f32 %v315_v56  ;;  %v327_v21 = vmul.f32 -0.5, %v902_v50 }
  0xe8   :  { %669 = vlog2.f32 %v364_v59  ;;  %vm946_vm11 = vcmp.lt.f32.partialorder %v343_v20, 0.0004427343  ;;  %vm979_vm14 = vcmp.lt.f32.partialorder %v321_v48, 0.0004427343 }
  0xe9   :  { %v120_v25 = vmin.f32 %v113_v23, 1.0  ;;  %v129_v26 = vmul.f32 %v121_v24, %v99_v63  ;;  %671 = vlog2.f32 %v355_v60 }
  0xea   :  { %v654_v27 = vpop.eup %653  ;;  %673 = vrcp.f32 %v124_v45 }
  0xeb   :  { %v128_v28 = vmul.f32 %v120_v25, %v97_v6  ;;  %v656_v29 = vpop.eup %655  ;;  %v133_v30 = vmul.f32 %v129_v26, %v864_v0  ;;  %v117_v31 = vmul.f32 0.996, %v654_v27  ;;  %v340_v6 = vmul.f32 -0.5, %v900_v47 }
  0xec   :  { %v119_v33 = vmul.f32 0.996, %v656_v29  ;;  %v658_v63 = vpop.eup %657  ;;  %675 = vlog2.f32 %v324_v62 }
  0xed   :  { %v132_v32 = vmul.f32 %v128_v28, %v866_v1  ;;  %v122_v34 = vmin.f32 %v117_v31, 1.0  ;;  %v660_v7 = vpop.eup %659  ;;  %v341_v16 = vadd.f32 1.0, %v340_v6  ;;  %v308_v22 = vmul.f32 0.6931472, %v658_v63 }
  0xee   :  { %v123_v35 = vmin.f32 %v119_v33, 1.0  ;;  %v662_v8 = vpop.eup %661  ;;  %v299_v23 = vmul.f32 0.6931472, %v660_v7  ;;  %v367_v28 = vmul.f32 -0.5, %v908_v54  ;;  %v358_v33 = vmul.f32 -0.5, %v911_v55 }
  0xef   :  { %566 = vmatprep.mubr.f32.mxu0 %v132_v32  ;;  %v130_v36 = vmul.f32 %v122_v34, %v101_v15  ;;  %v664_v9 = vpop.eup %663  ;;  %v352_v15 = vand.u32 2147483647, %v334_v46  ;;  %v348_v18 = vmul.f32 0.6931472, %v662_v8  ;;  %v342_v32 = vmul.f32 %v341_v16, %v900_v47 }
  0xf0   :  { %567 = vmatmul.mubr.f32.vlgmr.msra.gmra.mrb[0].mxu0 %v133_v30  ;;  %v131_v37 = vmul.f32 %v123_v35, %v103_v12  ;;  %v350_v12 = vadd.f32 1.0, %v349_v61  ;;  %v339_v24 = vmul.f32 0.6931472, %v664_v9  ;;  %v932_v29 = vpop.eup %665  ;;  %v319_v35 = vadd.f32 1.0, %v318_v17 }
  0xf1   :  { %v134_v38 = vmul.f32 %v130_v36, %v874_v5  ;;  %vm934_vm9 = vcmp.lt.f32.partialorder %v352_v15, 0.0004427343  ;;  %v668_v34 = vpop.eup %667  ;;  %v370_v47 = vand.u32 2147483647, %v908_v54  ;;  %v359_v57 = vadd.f32 1.0, %v358_v33 }
  0xf2   :  { %v135_v39 = vmul.f32 %v131_v37, %v868_v2  ;;  %v351_v27 = vmul.f32 %v350_v12, %v334_v46  ;;  %v368_v46 = vadd.f32 1.0, %v367_v28  ;;  %v317_v56 = vmul.f32 0.6931472, %v668_v34 }
  0xf3   :  { %569 = vmatprep.mubr.f32.mxu1 %v134_v38  ;;  %v330_v38 = vand.u32 2147483647, %v902_v50  ;;  %v361_v61 = vand.u32 2147483647, %v911_v55  ;;  %v320_v3 = vmul.f32 %v319_v35, %v904_v52  ;;  %vm974_vm13 = vcmp.lt.f32.partialorder %v370_v47, 0.0004427343 }
  0xf4   :  { %570 = vmatmul.mubr.f32.vlgmr.msra.gmra.mrb[0].mxu1 %v135_v39  ;;  %v354_v36 = vsel %vm934_vm9, %v351_v27, %v348_v18  ;;  %v670_v39 = vpop.eup %669  ;;  %v369_v6 = vmul.f32 %v368_v46, %v908_v54  ;;  %v360_v12 = vmul.f32 %v359_v57, %v911_v55 }
  0xf5   :  { %v672_v45 = vpop.eup %671  ;;  %v366_v60 = vmul.f32 0.6931472, %v670_v39  ;;  %vm968_vm12 = vcmp.lt.f32.partialorder %v330_v38, 0.0004427343  ;;  %v323_v11 = vsel %vm979_vm14, %v320_v3, %v317_v56  ;;  %vm989_vm15 = vcmp.lt.f32.partialorder %v361_v61, 0.0004427343 }
  0xf6   :  { %v674_v51 = vpop.eup %673  ;;  %v357_v4 = vmul.f32 0.6931472, %v672_v45 }
  0xf7   :  { %v676_v58 = vpop.eup %675  ;;  %v372_v15 = vsel %vm974_vm13, %v369_v6, %v366_v60 }
  0xf8   :  { %v326_v10 = vmul.f32 0.6931472, %v676_v58  ;;  %v363_v55 = vsel %vm989_vm15, %v360_v12, %v357_v4 }
  0xf9   :  { %v375_v30 = vsub.f32 %v323_v11, %v363_v55 }
  0xfb   :  { %v379_v56 = vmul.f32 0.5, %v375_v30 }
 0x1c3   :  { %v884_v40 = vpop.f32.mrb[0].mxu0 }
 0x1c4   :  { %v886_v41 = vpop.f32.mrb[1].mxu0  ;;  %v238_v0 = vmul.f32 %v884_v40, %v884_v40 }
 0x1c5   :  { %v237_v1 = vmul.f32 %v886_v41, %v886_v41 }
 0x1c6   :  { %243 = vadd.xlane.f32.xlu1 %v238_v0  ;;  %v314_v0 = vsel %vm926_vm8, %v311_v14, %v308_v22 }
 0x1c7   :  { %241 = vadd.xlane.f32.xlu0 %v237_v1  ;;  %v892_v42 = vpop.f32.mrb[0].mxu1  ;;  %v305_v1 = vsel %vm938_vm10, %v302_v13, %v299_v23  ;;  %v374_v53 = vsub.f32 %v314_v0, %v354_v36 }
 0x1c8   :  { %v894_v43 = vpop.f32.mrb[1].mxu1  ;;  %v240_v2 = vmul.f32 %v892_v42, %v892_v42 }
 0x1c9   :  { %v239_v5 = vmul.f32 %v894_v43, %v894_v43  ;;  %v378_v9 = vmul.f32 0.5, %v374_v53 }
 0x1ca   :  { %247 = vadd.xlane.f32.xlu1 %v240_v2  ;;  %v345_v2 = vsel %vm946_vm11, %v342_v32, %v339_v24 }
 0x1cb   :  { %245 = vadd.xlane.f32.xlu0 %v239_v5  ;;  %v328_v5 = vadd.f32 1.0, %v327_v21  ;;  %v373_v59 = vsub.f32 %v305_v1, %v345_v2 }
 0x1cd   :  { %v329_v62 = vmul.f32 %v328_v5, %v902_v50  ;;  %v377_v14 = vmul.f32 0.5, %v373_v59 }
 0x1cf   :  { %v332_v23 = vsel %vm968_vm12, %v329_v62, %v326_v10 }
 0x1d0   :  { %v376_v28 = vsub.f32 %v332_v23, %v372_v15 }
 0x253   :  { %v919_v19 = vpop.xlane.xlu1 %243 }
 0x254   :  { %677 = vrsqrt.f32 %v919_v19  ;;  %v924_v25 = vpop.xlane.xlu0 %241  ;;  %vm258_vm0 = vcmp.eq.f32.partialorder %v919_v19, inf  ;;  %v261_v16 = vand.u32 2147483648, %v919_v19  ;;  %vm260_vm1 = vcmp.eq.f32.partialorder %v919_v19, 0.0 }
 0x255   :  { %679 = vrsqrt.f32 %v924_v25  ;;  %vm251_vm2 = vcmp.eq.f32.partialorder %v924_v25, inf  ;;  %v254_v20 = vand.u32 2147483648, %v924_v25  ;;  %vm253_vm3 = vcmp.eq.f32.partialorder %v924_v25, 0.0 }
 0x257   :  { %v957_v44 = vpop.xlane.xlu1 %247 }
 0x258   :  { %681 = vrsqrt.f32 %v957_v44  ;;  %v962_v49 = vpop.xlane.xlu0 %245  ;;  %vm272_vm4 = vcmp.eq.f32.partialorder %v957_v44, inf  ;;  %vm274_vm5 = vcmp.eq.f32.partialorder %v957_v44, 0.0  ;;  %v275_v36 = vand.u32 2147483648, %v957_v44 }
 0x259   :  { %683 = vrsqrt.f32 %v962_v49  ;;  %vm265_vm6 = vcmp.eq.f32.partialorder %v962_v49, inf  ;;  %vm267_vm7 = vcmp.eq.f32.partialorder %v962_v49, 0.0  ;;  %v268_v0 = vand.u32 2147483648, %v962_v49 }
 0x25a   :  { %685 = vrcp.f32 %v902_v50 }
 0x25b   :  { %687 = vrcp.f32 %v904_v52 }
 0x25e   :  { %v678_v50 = vpop.eup %677 }
 0x25f   :  { %v680_v13 = vpop.eup %679  ;;  %v257_v54 = vmul.f32 %v678_v50, %v919_v19 }
 0x260   :  { %v250_v17 = vmul.f32 %v680_v13, %v924_v25 }
 0x261   :  { %v259_v18 = vsel %vm258_vm0, %v919_v19, %v257_v54 }
 0x262   :  { %v262_v21 = vsel %vm260_vm1, %v261_v16, %v259_v18  ;;  %v252_v22 = vsel %vm251_vm2, %v924_v25, %v250_v17  ;;  %v682_v24 = vpop.eup %681 }
 0x263   :  { %v278_v26 = vmax.f32 %v262_v21, 1e-15  ;;  %v255_v27 = vsel %vm253_vm3, %v254_v20, %v252_v22  ;;  %v684_v31 = vpop.eup %683  ;;  %v271_v33 = vmul.f32 %v682_v24, %v957_v44 }
 0x264   :  { %v277_v32 = vmax.f32 %v255_v27, 1e-15  ;;  %v686_v34 = vpop.eup %685  ;;  %v264_v37 = vmul.f32 %v684_v31, %v962_v49 }
 0x265   :  { %v284_v35 = vmul.f32 %v932_v29, %v278_v26  ;;  %v273_v39 = vsel %vm272_vm4, %v957_v44, %v271_v33  ;;  %v688_v1 = vpop.eup %687  ;;  %689 = vrcp.f32 %v278_v26 }
 0x266   :  { %v282_v38 = vmul.f32 %v674_v51, %v277_v32  ;;  %v276_v5 = vsel %vm274_vm5, %v275_v36, %v273_v39  ;;  %v266_v29 = vsel %vm265_vm6, %v962_v49, %v264_v37  ;;  %691 = vrcp.f32 %v277_v32 }
 0x267   :  { %v382_v2 = vmul.f32 %v378_v9, %v284_v35  ;;  %v280_v46 = vmax.f32 %v276_v5, 1e-15  ;;  %v269_v47 = vsel %vm267_vm7, %v268_v0, %v266_v29  ;;  %v380_v51 = vmul.f32 0.5, %v376_v28 }
 0x268   :  { %v381_v45 = vmul.f32 %v377_v14, %v282_v38  ;;  %v279_v48 = vmax.f32 %v269_v47, 1e-15 }
 0x269   :  { %693 = vtanh.f32 %v382_v2  ;;  %v288_v53 = vmul.f32 %v686_v34, %v280_v46 }
 0x26a   :  { %695 = vtanh.f32 %v381_v45  ;;  %v286_v57 = vmul.f32 %v688_v1, %v279_v48 }
 0x26b   :  { %v384_v58 = vmul.f32 %v380_v51, %v288_v53  ;;  %697 = vrcp.f32 %v280_v46 }
 0x26c   :  { %v383_v59 = vmul.f32 %v379_v56, %v286_v57  ;;  %699 = vrcp.f32 %v279_v48 }
 0x26d   :  { %701 = vtanh.f32 %v384_v58 }
 0x26e   :  { %703 = vtanh.f32 %v383_v59 }
 0x26f   :  { %v690_v60 = vpop.eup %689 }
 0x270   :  { %v692_v61 = vpop.eup %691 }
 0x273   :  { %v694_v62 = vpop.eup %693 }
 0x274   :  { %v696_v63 = vpop.eup %695  ;;  %v392_v3 = vmul.f32 %v694_v62, %v690_v60 }
 0x275   :  { %v390_v4 = vmul.f32 %v696_v63, %v692_v61  ;;  %v698_v6 = vpop.eup %697 }
 0x276   :  { %v1027_v7 = vsel %vm260_vm1, 0.0, %v392_v3  ;;  %v700_v8 = vpop.eup %699 }
 0x277   :  { %v406_v50 = vmul.f32 %v1027_v7, %v278_v26  ;;  %v1032_v9 = vsel %vm253_vm3, 0.0, %v390_v4  ;;  %v702_v10 = vpop.eup %701 }
 0x278   :  { %v405_v11 = vmul.f32 %v1032_v9, %v277_v32  ;;  %v704_v12 = vpop.eup %703  ;;  %v396_v54 = vmul.f32 %v702_v10, %v698_v6 }
 0x279   :  { %v410_v13 = vmax.f32 %v406_v50, 1e-15  ;;  %v394_v15 = vmul.f32 %v704_v12, %v700_v8 }
 0x27a   :  { %v409_v14 = vmax.f32 %v405_v11, 1e-15  ;;  %v1037_v19 = vsel %vm274_vm5, 0.0, %v396_v54 }
 0x27b   :  { %v426_v52 = vmin.f32 %v410_v13, 0.996  ;;  %v408_v17 = vmul.f32 %v1037_v19, %v280_v46  ;;  %v1042_v25 = vsel %vm267_vm7, 0.0, %v394_v15 }
 0x27c   :  { %v425_v16 = vmin.f32 %v409_v14, 0.996  ;;  %v407_v55 = vmul.f32 %v1042_v25, %v279_v48 }
 0x27d   :  { %705 = vtanh.f32 %v426_v52  ;;  %v412_v18 = vmax.f32 %v408_v17, 1e-15 }
 0x27e   :  { %707 = vrcp.f32 %v426_v52  ;;  %v411_v20 = vmax.f32 %v407_v55, 1e-15 }
 0x27f   :  { %709 = vtanh.f32 %v425_v16  ;;  %v428_v21 = vmin.f32 %v412_v18, 0.996 }
 0x280   :  { %711 = vrcp.f32 %v425_v16  ;;  %v427_v44 = vmin.f32 %v411_v20, 0.996 }
 0x281   :  { %713 = vrcp.f32 %v410_v13 }
 0x282   :  { %715 = vtanh.f32 %v428_v21 }
 0x283   :  { %717 = vrcp.f32 %v428_v21 }
 0x284   :  { %719 = vrcp.f32 %v409_v14 }
 0x285   :  { %721 = vtanh.f32 %v427_v44 }
 0x286   :  { %723 = vrcp.f32 %v427_v44 }
 0x287   :  { %v706_v22 = vpop.eup %705  ;;  %725 = vrcp.f32 %v412_v18 }
 0x288   :  { %v708_v49 = vpop.eup %707  ;;  %727 = vrcp.f32 %v411_v20 }
 0x289   :  { %v710_v23 = vpop.eup %709  ;;  %v436_v24 = vmul.f32 %v708_v49, %v706_v22 }
 0x28a   :  { %v712_v26 = vpop.eup %711 }
 0x28b   :  { %v714_v27 = vpop.eup %713  ;;  %v442_v28 = vmul.f32 %v436_v24, %v426_v52  ;;  %v434_v30 = vmul.f32 %v712_v26, %v710_v23 }
 0x28c   :  { %v716_v31 = vpop.eup %715  ;;  %v416_v0 = vmul.f32 0.996, %v714_v27 }
 0x28d   :  { %v718_v32 = vpop.eup %717  ;;  %v441_v33 = vmul.f32 %v434_v30, %v425_v16  ;;  %v446_v34 = vmax.f32 %v442_v28, 1e-15 }
 0x28e   :  { %v720_v35 = vpop.eup %719  ;;  %v440_v36 = vmul.f32 %v718_v32, %v716_v31  ;;  %v422_v47 = vmin.f32 %v416_v0, 1.0 }
 0x28f   :  { %v722_v37 = vpop.eup %721  ;;  %v445_v38 = vmax.f32 %v441_v33, 1e-15  ;;  %729 = vrcp.f32 %v446_v34  ;;  %v414_v29 = vmul.f32 0.996, %v720_v35 }
 0x290   :  { %v724_v39 = vpop.eup %723  ;;  %v444_v1 = vmul.f32 %v440_v36, %v428_v21  ;;  %v462_v57 = vmul.f32 %v422_v47, %v1027_v7  ;;  %v513_v7 = vld [vmem:[%s1073_s2] ss:$0 sm:$0xff]  ;;  %s813_s2 = smov [#allocation7]  }
 0x291   :  { %v438_v2 = vmul.f32 %v724_v39, %v722_v37  ;;  %731 = vrcp.f32 %v445_v38  ;;  %v726_v5 = vpop.eup %725  ;;  %v421_v56 = vmin.f32 %v414_v29, 1.0  ;;  %s496_s11 = sshll.u32 %s813_s2, 4  ;;  %s497_s11 = int_to_ptr.vmem [resolvable:$true] %s496_s11 }
 0x292   :  { %v448_v45 = vmax.f32 %v444_v1, 1e-15  ;;  %v728_v48 = vpop.eup %727  ;;  %v420_v51 = vmul.f32 0.996, %v726_v5  ;;  %v466_v3 = vmul.f32 %v462_v57, %v436_v24  ;;  %s781_s12 = scalar_lea.vmem %s497_s11, 512  ;;  %p786_p3 = scmp.lt.s32.totalorder %s497_s11, %s497_s11 }
 0x293   :  { %v443_v46 = vmul.f32 %v438_v2, %v427_v44  ;;  %v418_v58 = vmul.f32 0.996, %v728_v48  ;;  %v461_v61 = vmul.f32 %v421_v56, %v1032_v9  ;;  %p782_p2 = scmp.ne.s32.totalorder %s497_s11, %s781_s12  ;;  %p787_p4 = scmp.lt.s32.totalorder %s781_s12, %s781_s12 }
 0x294   :  { %733 = vrcp.f32 %v448_v45  ;;  %v424_v60 = vmin.f32 %v420_v51, 1.0 }
 0x295   :  { %v447_v53 = vmax.f32 %v443_v46, 1e-15  ;;  %v423_v4 = vmin.f32 %v418_v58, 1.0  ;;  %v465_v11 = vmul.f32 %v461_v61, %v434_v30  ;;  %p788_p5 = por %p787_p4, %p786_p3 }
 0x296   :  { %v464_v50 = vmul.f32 %v424_v60, %v1037_v19 }
 0x297   :  { %735 = vrcp.f32 %v447_v53  ;;  %v463_v14 = vmul.f32 %v423_v4, %v1042_v25  ;;  %p789_p6 = pnand %p788_p5, %p782_p2 }
 0x298   :  { %v468_v16 = vmul.f32 %v464_v50, %v440_v36 }
 0x299   :  { %v730_v59 = vpop.eup %729  ;;  %v467_v21 = vmul.f32 %v463_v14, %v438_v2 }
 0x29a   :  { %v452_v62 = vmul.f32 0.996, %v730_v59 }
 0x29b   :  { %v732_v63 = vpop.eup %731 }
 0x29c   :  { %v450_v6 = vmul.f32 0.996, %v732_v63  ;;  %v458_v8 = vmin.f32 %v452_v62, 1.0 }
 0x29e   :  { %v734_v10 = vpop.eup %733  ;;  %v457_v12 = vmin.f32 %v450_v6, 1.0  ;;  %v470_v13 = vmul.f32 %v466_v3, %v458_v8 }
 0x29f   :  { %v456_v54 = vmul.f32 0.996, %v734_v10 }
 0x2a0   :  { %v469_v9 = vmul.f32 %v465_v11, %v457_v12  ;;  %v474_v15 = vmul.f32 %v884_v40, %v470_v13 }
 0x2a1   :  { %v736_v52 = vpop.eup %735  ;;  %v460_v17 = vmin.f32 %v456_v54, 1.0 }
 0x2a2   :  { %v454_v55 = vmul.f32 0.996, %v736_v52  ;;  %v473_v19 = vmul.f32 %v469_v9, %v886_v41  ;;  %v484_v18 = vadd.f32 %v513_v7, %v474_v15 }
 0x2a3   :  { %v472_v20 = vmul.f32 %v468_v16, %v460_v17 }
 0x2a4   :  { %v459_v44 = vmin.f32 %v454_v55, 1.0  ;;  %v483_v22 = vadd.f32 %v513_v7, %v473_v19  ;;  %488 = vst [vmem:[#allocation7 + $0x8] sm:$0xff] %v484_v18 }
 0x2a5   :  { %v476_v49 = vmul.f32 %v892_v42, %v472_v20 }
 0x2a6   :  { %v471_v23 = vmul.f32 %v467_v21, %v459_v44  ;;  %487 = vst [vmem:[#allocation7] sm:$0xff] %v483_v22 }
 0x2a7   :  { %v486_v25 = vadd.f32 %v513_v7, %v476_v49 }
 0x2a8   :  { %v475_v40 = vmul.f32 %v471_v23, %v894_v43 }
 0x2a9   :  { %490 = vst [vmem:[#allocation7 + $0x18] sm:$0xff] %v486_v25 }
 0x2aa   :  { %v485_v24 = vadd.f32 %v513_v7, %v475_v40 }
 0x2ac   :  { %489 = vst [vmem:[#allocation7 + $0x10] sm:$0xff] %v485_v24 }
 0x2ad   :  { %792 = shalt.err (!%p789_p6)
}
 0x2ae   :  { %s793_s15 = scalar_lea.hbm %s1074_s3, 512 }
 0x2af   :  { %p794_p7 = scmp.ne.s32.totalorder %s1074_s3, %s793_s15  ;;  %p797_p8 = scmp.lt.u32.totalorder %s793_s15, %s1074_s3 }
 0x2b1   :  { %p799_p9 = pnand %p797_p8, %p794_p7 }
 0x2b3   :  { %802 = shalt.err (!%p799_p9)
}
 0x2b4   :  { %502 = dma.vmem_to_hbm [thread:$0]  %s497_s11, 512, %s1074_s3, [#allocation4], %s810_s22, %s810_s22, %s811_s23  }
 0x2b5   :  { %807 = dma.done.wait [#allocation4], 512  }
 0x2b6   :  { %808 = vsyncadd [#allocation4], 4294966784 }
 0x2b7   :  { %506 = vsyncpa [#allocation3], 1 }
 0x2b8   :  { %507 = vsyncpa [#allocation6], 1 }
 0x2b9   :  { %508 = vsyncpa [#allocation4], 1 }

</bundles_post_ra>
